<compile_context>
chip_gen: v7x
topology: tpu7x:2x2x1
jax: 0.10.0
libtpu: 0.0.40
codegen_flags: <defaults>
</compile_context>

<pallas_src>
import functools

import jax
import jax.numpy as jnp
from jax import lax
from jax.experimental import pallas as pl
from jax.experimental.pallas import tpu as pltpu


# ----------------------------- kernels --------------------------------------

def _sep_unit_kernel(x_ref, scale_ref, shift_ref, wdw_ref, wpw_ref,
                     y_ref, stats_ref, pad_scr, dw_scr,
                     *, K, stride, pad, apply_affine):
    """[affine(BN)] + ReLU + depthwise KxK (VPU) + 1x1 conv (MXU) + BN stats.

    x_ref     : (nb, Hi, Wi, Cin)      input block (nb batch elements)
    scale_ref : (1, Cin)               pre-activation affine scale (unused st.1)
    shift_ref : (1, Cin)               pre-activation affine shift (unused st.1)
    wdw_ref   : (K*K, Cin)             depthwise taps (f32)
    wpw_ref   : (Cin, Cout)            pointwise weights (mxu dtype)
    y_ref     : (nb, Ho, Wo, Cout)     stage output
    stats_ref : (1, 2, Cout)           [channel sum; channel sum-of-sq]
    pad_scr   : VMEM (Hi+2p, Wi+2p, Cin) f32 padded activation buffer
    dw_scr    : VMEM (nb*Ho*Wo, Cin)   depthwise result (matmul LHS, mxu dtype)
    """
    nb, Hi, Wi, Cin = x_ref.shape
    _, Ho, Wo, Cout = y_ref.shape
    Hp, Wp = Hi + 2 * pad, Wi + 2 * pad

    # Zero only the halo ring (interior is fully overwritten below).  Done
    # every step so "parallel" grid semantics stay race/assumption-free.
    if pad > 0:
        zrow = jnp.zeros((pad, Wp, Cin), jnp.float32)
        pad_scr[0:pad, :, :] = zrow
        pad_scr[Hp - pad:Hp, :, :] = zrow
        zcol = jnp.zeros((Hi, pad, Cin), jnp.float32)
        pad_scr[pad:pad + Hi, 0:pad, :] = zcol
        pad_scr[pad:pad + Hi, Wp - pad:Wp, :] = zcol

    if apply_affine:
        scale = scale_ref[...].astype(jnp.float32)       # (1, Cin)
        shift = shift_ref[...].astype(jnp.float32)
    wdw = wdw_ref[...].astype(jnp.float32)               # (K*K, Cin), hoisted

    for b in range(nb):                                   # static unroll
        # Prologue: (affine +) ReLU, written into the padded scratch interior.
        z = x_ref[b].astype(jnp.float32)
        if apply_affine:
            z = z * scale + shift
        pad_scr[pad:pad + Hi, pad:pad + Wi, :] = jnp.maximum(z, 0.0)

        # Depthwise KxK on the VPU (no K^2 MXU FLOP inflation).
        dw = jnp.zeros((Ho, Wo, Cin), jnp.float32)
        for ki in range(K):
            for kj in range(K):
                if stride == 1:
                    win = pad_scr[ki:ki + Ho, kj:kj + Wo, :]
                else:
                    win = pad_scr[pl.ds(ki, Ho, stride),
                                  pl.ds(kj, Wo, stride), :]
                dw = dw + win * wdw[ki * K + kj]
        dw_scr[b * Ho * Wo:(b + 1) * Ho * Wo, :] = (
            dw.reshape(Ho * Wo, Cin).astype(dw_scr.dtype))

    # Single pointwise matmul on the MXU: (nb*Ho*Wo, Cin) @ (Cin, Cout).
    acc = jnp.dot(dw_scr[...], wpw_ref[...],
                  preferred_element_type=jnp.float32)

    y_ref[...] = acc.reshape(nb, Ho, Wo, Cout).astype(y_ref.dtype)
    # Fused per-block BatchNorm statistics, packed into one output.
    stats_ref[0, 0:1, :] = jnp.sum(acc, axis=0, keepdims=True)
    stats_ref[0, 1:2, :] = jnp.sum(acc * acc, axis=0, keepdims=True)


def _bn_apply_kernel(y_ref, scale_ref, shift_ref, o_ref):
    """Final BatchNorm affine, lane-dense ((N*Ho2) rows x (Wo2*Cout) lanes)."""
    o_ref[...] = (y_ref[...].astype(jnp.float32) * scale_ref[...]
                  + shift_ref[...]).astype(o_ref.dtype)


# ----------------------------- wrappers -------------------------------------

def _fold_bn(s, sq, count, gamma, beta, eps):
    # TODO(synk): E[x^2]-E[x]^2 in f32 is fragile for very large N*H*W; use a
    # two-pass / Welford reduction for production shapes.
    mean = s / count
    var = sq / count - mean * mean          # biased variance (torch train mode)
    scale = gamma / jnp.sqrt(var + eps)
    shift = beta - mean * scale
    return scale, shift


def sepconv_pallas(x_nchw, params, K, stride, pad, eps=1e-5,
                   mxu_dtype=jnp.float32, inter_dtype=jnp.float32,
                   batch_block=1):
    N, Cin, H, W = x_nchw.shape
    assert N % batch_block == 0
    nb = batch_block
    grid_n = N // nb
    x = jnp.transpose(x_nchw, (0, 2, 3, 1)).astype(jnp.float32)   # -> NHWC

    # Weights in kernel layout (depthwise stays f32 for the VPU MACs; the
    # pointwise matmul operands use mxu_dtype).
    wdw1 = jnp.transpose(params["dw1"][:, 0], (1, 2, 0)).reshape(K * K, Cin)
    wpw1 = jnp.transpose(params["pw1"][:, :, 0, 0], (1, 0)).astype(mxu_dtype)
    wdw2 = jnp.transpose(params["dw2"][:, 0], (1, 2, 0)).reshape(K * K, Cin)
    wpw2 = jnp.transpose(params["pw2"][:, :, 0, 0], (1, 0)).astype(mxu_dtype)
    Cout = wpw2.shape[1]

    Ho = (H + 2 * pad - K) // stride + 1
    Wo = (W + 2 * pad - K) // stride + 1
    Ho2 = Ho + 2 * pad - K + 1
    Wo2 = Wo + 2 * pad - K + 1

    # Explicit VMEM budget: scratch + double-buffered in/out blocks + weights.
    mxu_b = jnp.dtype(mxu_dtype).itemsize

    def unit_bytes(Hi, Wi, Ci, Ho_, Wo_, Co):
        return ((Hi + 2 * pad) * (Wi + 2 * pad) * Ci * 4
                + nb * Ho_ * Wo_ * Ci * mxu_b
                + 2 * (nb * Hi * Wi * Ci * 4 + nb * Ho_ * Wo_ * Co * 4
                       + 2 * Co * 4 + 2 * Ci * 4)
                + K * K * Ci * 4 + Ci * Co * mxu_b)

    try:
        vmem_cap = int(pltpu.get_tpu_info().vmem_capacity_bytes)
    except Exception:  # pragma: no cover - conservative fallback (v7x floor)
        vmem_cap = 64 * 1024 * 1024
    need = max(unit_bytes(H, W, Cin, Ho, Wo, Cin),
               unit_bytes(Ho, Wo, Cin, Ho2, Wo2, Cout))
    vmem_limit = int(min(vmem_cap, max(32 * 1024 * 1024, 2 * need)))

    def run_unit(inp, scale, shift, wdw, wpw, Hi, Wi, Ci, Co, Ho_, Wo_,
                 stride_, apply_affine):
        return pl.pallas_call(
            functools.partial(_sep_unit_kernel, K=K, stride=stride_, pad=pad,
                              apply_affine=apply_affine),
            out_shape=(jax.ShapeDtypeStruct((N, Ho_, Wo_, Co), inter_dtype),
                       jax.ShapeDtypeStruct((grid_n, 2, Co), jnp.float32)),
            grid=(grid_n,),
            in_specs=[
                pl.BlockSpec((nb, Hi, Wi, Ci), lambda n: (n, 0, 0, 0)),
                pl.BlockSpec((1, Ci), lambda n: (0, 0)),
                pl.BlockSpec((1, Ci), lambda n: (0, 0)),
                pl.BlockSpec((K * K, Ci), lambda n: (0, 0)),
                pl.BlockSpec((Ci, Co), lambda n: (0, 0)),
            ],
            out_specs=(
                pl.BlockSpec((nb, Ho_, Wo_, Co), lambda n: (n, 0, 0, 0)),
                pl.BlockSpec((1, 2, Co), lambda n: (n, 0, 0)),
            ),
            scratch_shapes=[
                pltpu.VMEM((Hi + 2 * pad, Wi + 2 * pad, Ci), jnp.float32),
                pltpu.VMEM((nb * Ho_ * Wo_, Ci), mxu_dtype),
            ],
            compiler_params=pltpu.CompilerParams(
                dimension_semantics=("parallel",),
                vmem_limit_bytes=vmem_limit),
        )(inp, scale, shift, wdw, wpw)

    # Stage 1: ReLU -> dw(K, stride) -> pw(Cin->Cin), BN(Cin) stats fused.
    dummy = jnp.zeros((1, Cin), jnp.float32)   # unused (apply_affine=False)
    y1, st1 = run_unit(x, dummy, dummy, wdw1, wpw1,
                       H, W, Cin, Cin, Ho, Wo, stride, apply_affine=False)
    s1 = jnp.sum(st1, axis=0)                                 # (2, Cin)
    scale1, shift1 = _fold_bn(s1[0], s1[1], N * Ho * Wo,
                              params["g1"], params["b1"], eps)

    # Stage 2: BN(Cin)+ReLU -> dw(K, 1) -> pw(Cin->Cout), BN(Cout) stats fused.
    y2, st2 = run_unit(y1, scale1.reshape(1, Cin).astype(jnp.float32),
                       shift1.reshape(1, Cin).astype(jnp.float32),
                       wdw2, wpw2, Ho, Wo, Cin, Cout, Ho2, Wo2, 1,
                       apply_affine=True)
    s2 = jnp.sum(st2, axis=0)                                 # (2, Cout)
    scale2, shift2 = _fold_bn(s2[0], s2[1], N * Ho2 * Wo2,
                              params["g2"], params["b2"], eps)

    # Final BN(Cout) affine: collapse (N, Ho2) into one row axis and
    # (Wo2, Cout) onto the lane axis (free contiguous HBM reshapes), tile up
    # to 512 rows per step, and alias the output onto the input when dtypes
    # match (pure memory-bound elementwise pass).
    rows, lanes = N * Ho2, Wo2 * Cout
    y2f = y2.reshape(rows, lanes)
    scale_t = jnp.tile(scale2, Wo2).reshape(1, lanes).astype(jnp.float32)
    shift_t = jnp.tile(shift2, Wo2).reshape(1, lanes).astype(jnp.float32)
    tr = rows if rows <= 512 else 512
    out_dtype = jnp.float32
    aliases = {0: 0} if inter_dtype is jnp.float32 else {}
    out = pl.pallas_call(
        _bn_apply_kernel,
        out_shape=jax.ShapeDtypeStruct((rows, lanes), out_dtype),
        grid=(pl.cdiv(rows, tr),),
        in_specs=[
            pl.BlockSpec((tr, lanes), lambda r: (r, 0)),
            pl.BlockSpec((1, lanes), lambda r: (0, 0)),
            pl.BlockSpec((1, lanes), lambda r: (0, 0)),
        ],
        out_specs=pl.BlockSpec((tr, lanes), lambda r: (r, 0)),
        input_output_aliases=aliases,
        compiler_params=pltpu.CompilerParams(
            dimension_semantics=("parallel",)),
    )(y2f, scale_t, shift_t)

    out = out.reshape(N, Ho2, Wo2, Cout)
    return jnp.transpose(out, (0, 3, 1, 2))    # back to NCHW


# --------------------------- pure-JAX reference ------------------------------

def ref_sepconv(x, p, K, stride, pad, eps=1e-5):
    def dw(x, w, s):
        return lax.conv_general_dilated(
            x, w, (s, s), [(pad, pad), (pad, pad)],
            dimension_numbers=("NCHW", "OIHW", "NCHW"),
            feature_group_count=x.shape[1])

    def pw(x, w):
        return lax.conv_general_dilated(
            x, w, (1, 1), [(0, 0), (0, 0)],
            dimension_numbers=("NCHW", "OIHW", "NCHW"))

    def bn(x, g, b):
        mean = jnp.mean(x, axis=(0, 2, 3), keepdims=True)
        var = jnp.mean((x - mean) ** 2, axis=(0, 2, 3), keepdims=True)
        return (x - mean) / jnp.sqrt(var + eps) * g[None, :, None, None] \
            + b[None, :, None, None]

    y = jnp.maximum(x, 0.0)
    y = pw(dw(y, p["dw1"], stride), p["pw1"])
    y = bn(y, p["g1"], p["b1"])
    y = jnp.maximum(y, 0.0)
    y = pw(dw(y, p["dw2"], 1), p["pw2"])
    return bn(y, p["g2"], p["b2"])


# --------------------------------- main --------------------------------------

if __name__ == "__main__":
    import numpy as np

    key = jax.random.PRNGKey(0)
    ks = jax.random.split(key, 8)
    N, Cin, Cout, H, W = 2, 4, 8, 16, 16
    K, stride, pad = 3, 1, 1

    x = jax.random.normal(ks[0], (N, Cin, H, W), jnp.float32)
    params = dict(
        dw1=0.3 * jax.random.normal(ks[1], (Cin, 1, K, K), jnp.float32),
        pw1=0.3 * jax.random.normal(ks[2], (Cin, Cin, 1, 1), jnp.float32),
        g1=1.0 + 0.1 * jax.random.normal(ks[3], (Cin,), jnp.float32),
        b1=0.1 * jax.random.normal(ks[4], (Cin,), jnp.float32),
        dw2=0.3 * jax.random.normal(ks[5], (Cin, 1, K, K), jnp.float32),
        pw2=0.3 * jax.random.normal(ks[6], (Cout, Cin, 1, 1), jnp.float32),
        g2=1.0 + 0.1 * jax.random.normal(ks[7], (Cout,), jnp.float32),
        b2=jnp.zeros((Cout,), jnp.float32),
    )

    ref = jax.block_until_ready(ref_sepconv(x, params, K, stride, pad))

    # f32 MXU path (tight tolerance), one batch element per grid step
    # (grid of 2 parallel steps -> both v7x TensorCores get work).
    out = jax.block_until_ready(
        sepconv_pallas(x, params, K, stride, pad,
                       mxu_dtype=jnp.float32, inter_dtype=jnp.float32,
                       batch_block=1))
    np.testing.assert_allclose(np.asarray(out), np.asarray(ref),
                               rtol=1e-3, atol=1e-3)

    # bf16 MXU operands + bf16 intermediates + batch blocking (loose tolerance).
    out_bf16 = jax.block_until_ready(
        sepconv_pallas(x, params, K, stride, pad,
                       mxu_dtype=jnp.bfloat16, inter_dtype=jnp.bfloat16,
                       batch_block=2))
    np.testing.assert_allclose(np.asarray(out_bf16), np.asarray(ref),
                               rtol=5e-2, atol=1e-1)

    print("KERNEL_OK")
</pallas_src>

<mosaic_0001>
module attributes {stable_mosaic.version = 11 : i64} {
  func.func @_sep_unit_kernel(%arg0: i32, %arg1: memref<1x16x16x4xf32, #tpu.memory_space<vmem>>, %arg2: memref<1x4xf32, #tpu.memory_space<vmem>>, %arg3: memref<1x4xf32, #tpu.memory_space<vmem>>, %arg4: memref<9x4xf32, #tpu.memory_space<vmem>>, %arg5: memref<4x4xf32, #tpu.memory_space<vmem>>, %arg6: memref<1x16x16x4xf32, #tpu.memory_space<vmem>>, %arg7: memref<1x2x4xf32, #tpu.memory_space<vmem>>, %arg8: memref<18x18x4xf32, #tpu.memory_space<vmem>>, %arg9: memref<256x4xf32, #tpu.memory_space<vmem>>) attributes {dimension_semantics = [#tpu.dimension_semantics<parallel>], iteration_bounds = array<i64: 2>, scalar_prefetch = 0 : i64, scratch_operands = 2 : i64, tpu.core_type = #tpu.core_type<tc>, window_params = [{transform_indices = @transform_0, window_bounds = array<i64: 1, 16, 16, 4>}, {pipeline_mode = #tpu.pipeline_mode<synchronous>, transform_indices = @transform_1, window_bounds = array<i64: 1, 4>}, {pipeline_mode = #tpu.pipeline_mode<synchronous>, transform_indices = @transform_2, window_bounds = array<i64: 1, 4>}, {pipeline_mode = #tpu.pipeline_mode<synchronous>, transform_indices = @transform_3, window_bounds = array<i64: 9, 4>}, {pipeline_mode = #tpu.pipeline_mode<synchronous>, transform_indices = @transform_4, window_bounds = array<i64: 4, 4>}, {transform_indices = @transform_5, window_bounds = array<i64: 1, 16, 16, 4>}, {transform_indices = @transform_6, window_bounds = array<i64: 1, 2, 4>}]} {
    %cst = arith.constant 0.000000e+00 : f32
    %0 = vector.broadcast %cst : f32 to vector<1x18x4xf32>
    %c0 = arith.constant 0 : index
    %c0_0 = arith.constant 0 : index
    %c0_1 = arith.constant 0 : index
    %1 = vector.load %arg8[%c0, %c0_0, %c0_1] : memref<18x18x4xf32, #tpu.memory_space<vmem>>, vector<1x18x4xf32>
    tpu.vector_store %arg8[%c0, %c0_0, %c0_1], %0 {strides = array<i32>} : memref<18x18x4xf32, #tpu.memory_space<vmem>>, vector<1x18x4xf32>,
    %c17 = arith.constant 17 : index
    %c0_2 = arith.constant 0 : index
    %c0_3 = arith.constant 0 : index
    %2 = vector.load %arg8[%c17, %c0_2, %c0_3] : memref<18x18x4xf32, #tpu.memory_space<vmem>>, vector<1x18x4xf32>
    tpu.vector_store %arg8[%c17, %c0_2, %c0_3], %0 {strides = array<i32>} : memref<18x18x4xf32, #tpu.memory_space<vmem>>, vector<1x18x4xf32>,
    %cst_4 = arith.constant 0.000000e+00 : f32
    %3 = vector.broadcast %cst_4 : f32 to vector<16x1x4xf32>
    %c1 = arith.constant 1 : index
    %c0_5 = arith.constant 0 : index
    %c0_6 = arith.constant 0 : index
    %4 = vector.load %arg8[%c1, %c0_5, %c0_6] : memref<18x18x4xf32, #tpu.memory_space<vmem>>, vector<16x1x4xf32>
    tpu.vector_store %arg8[%c1, %c0_5, %c0_6], %3 {strides = array<i32>} : memref<18x18x4xf32, #tpu.memory_space<vmem>>, vector<16x1x4xf32>,
    %c1_7 = arith.constant 1 : index
    %c17_8 = arith.constant 17 : index
    %c0_9 = arith.constant 0 : index
    %5 = vector.load %arg8[%c1_7, %c17_8, %c0_9] : memref<18x18x4xf32, #tpu.memory_space<vmem>>, vector<16x1x4xf32>
    tpu.vector_store %arg8[%c1_7, %c17_8, %c0_9], %3 {strides = array<i32>} : memref<18x18x4xf32, #tpu.memory_space<vmem>>, vector<16x1x4xf32>,
    %c0_10 = arith.constant 0 : index
    %c0_11 = arith.constant 0 : index
    %6 = vector.load %arg4[%c0_10, %c0_11] : memref<9x4xf32, #tpu.memory_space<vmem>>, vector<9x4xf32>
    %c0_12 = arith.constant 0 : index
    %c0_13 = arith.constant 0 : index
    %c0_14 = arith.constant 0 : index
    %c0_15 = arith.constant 0 : index
    %7 = vector.load %arg1[%c0_12, %c0_13, %c0_14, %c0_15] : memref<1x16x16x4xf32, #tpu.memory_space<vmem>>, vector<1x16x16x4xf32>
    %8 = vector.shape_cast %7 : vector<1x16x16x4xf32> to vector<16x16x4xf32>
    %cst_16 = arith.constant 0.000000e+00 : f32
    %9 = vector.broadcast %cst_16 : f32 to vector<16x16x4xf32>
    %10 = arith.maximumf %8, %9 : vector<16x16x4xf32>
    %c1_17 = arith.constant 1 : index
    %c1_18 = arith.constant 1 : index
    %c0_19 = arith.constant 0 : index
    %11 = vector.load %arg8[%c1_17, %c1_18, %c0_19] : memref<18x18x4xf32, #tpu.memory_space<vmem>>, vector<16x16x4xf32>
    tpu.vector_store %arg8[%c1_17, %c1_18, %c0_19], %10 {strides = array<i32>} : memref<18x18x4xf32, #tpu.memory_space<vmem>>, vector<16x16x4xf32>,
    %cst_20 = arith.constant 0.000000e+00 : f32
    %12 = vector.broadcast %cst_20 : f32 to vector<16x16x4xf32>
    %c0_21 = arith.constant 0 : index
    %c0_22 = arith.constant 0 : index
    %c0_23 = arith.constant 0 : index
    %13 = vector.load %arg8[%c0_21, %c0_22, %c0_23] : memref<18x18x4xf32, #tpu.memory_space<vmem>>, vector<16x16x4xf32>
    %14 = vector.extract_strided_slice %6 {offsets = [0, 0], sizes = [1, 4], strides = [1, 1]} : vector<9x4xf32> to vector<1x4xf32>
    %15 = vector.shape_cast %14 : vector<1x4xf32> to vector<4xf32>
    %16 = vector.shape_cast %15 : vector<4xf32> to vector<1x1x4xf32>
    %17 = vector.broadcast %16 : vector<1x1x4xf32> to vector<16x16x4xf32>
    %18 = arith.mulf %13, %17 : vector<16x16x4xf32>
    %19 = arith.addf %12, %18 : vector<16x16x4xf32>
    %c0_24 = arith.constant 0 : index
    %c1_25 = arith.constant 1 : index
    %c0_26 = arith.constant 0 : index
    %20 = vector.load %arg8[%c0_24, %c1_25, %c0_26] : memref<18x18x4xf32, #tpu.memory_space<vmem>>, vector<16x16x4xf32>
    %21 = vector.extract_strided_slice %6 {offsets = [1, 0], sizes = [1, 4], strides = [1, 1]} : vector<9x4xf32> to vector<1x4xf32>
    %22 = vector.shape_cast %21 : vector<1x4xf32> to vector<4xf32>
    %23 = vector.shape_cast %22 : vector<4xf32> to vector<1x1x4xf32>
    %24 = vector.broadcast %23 : vector<1x1x4xf32> to vector<16x16x4xf32>
    %25 = arith.mulf %20, %24 : vector<16x16x4xf32>
    %26 = arith.addf %19, %25 : vector<16x16x4xf32>
    %c0_27 = arith.constant 0 : index
    %c2 = arith.constant 2 : index
    %c0_28 = arith.constant 0 : index
    %27 = vector.load %arg8[%c0_27, %c2, %c0_28] : memref<18x18x4xf32, #tpu.memory_space<vmem>>, vector<16x16x4xf32>
    %28 = vector.extract_strided_slice %6 {offsets = [2, 0], sizes = [1, 4], strides = [1, 1]} : vector<9x4xf32> to vector<1x4xf32>
    %29 = vector.shape_cast %28 : vector<1x4xf32> to vector<4xf32>
    %30 = vector.shape_cast %29 : vector<4xf32> to vector<1x1x4xf32>
    %31 = vector.broadcast %30 : vector<1x1x4xf32> to vector<16x16x4xf32>
    %32 = arith.mulf %27, %31 : vector<16x16x4xf32>
    %33 = arith.addf %26, %32 : vector<16x16x4xf32>
    %c1_29 = arith.constant 1 : index
    %c0_30 = arith.constant 0 : index
    %c0_31 = arith.constant 0 : index
    %34 = vector.load %arg8[%c1_29, %c0_30, %c0_31] : memref<18x18x4xf32, #tpu.memory_space<vmem>>, vector<16x16x4xf32>
    %35 = vector.extract_strided_slice %6 {offsets = [3, 0], sizes = [1, 4], strides = [1, 1]} : vector<9x4xf32> to vector<1x4xf32>
    %36 = vector.shape_cast %35 : vector<1x4xf32> to vector<4xf32>
    %37 = vector.shape_cast %36 : vector<4xf32> to vector<1x1x4xf32>
    %38 = vector.broadcast %37 : vector<1x1x4xf32> to vector<16x16x4xf32>
    %39 = arith.mulf %34, %38 : vector<16x16x4xf32>
    %40 = arith.addf %33, %39 : vector<16x16x4xf32>
    %c1_32 = arith.constant 1 : index
    %c1_33 = arith.constant 1 : index
    %c0_34 = arith.constant 0 : index
    %41 = vector.load %arg8[%c1_32, %c1_33, %c0_34] : memref<18x18x4xf32, #tpu.memory_space<vmem>>, vector<16x16x4xf32>
    %42 = vector.extract_strided_slice %6 {offsets = [4, 0], sizes = [1, 4], strides = [1, 1]} : vector<9x4xf32> to vector<1x4xf32>
    %43 = vector.shape_cast %42 : vector<1x4xf32> to vector<4xf32>
    %44 = vector.shape_cast %43 : vector<4xf32> to vector<1x1x4xf32>
    %45 = vector.broadcast %44 : vector<1x1x4xf32> to vector<16x16x4xf32>
    %46 = arith.mulf %41, %45 : vector<16x16x4xf32>
    %47 = arith.addf %40, %46 : vector<16x16x4xf32>
    %c1_35 = arith.constant 1 : index
    %c2_36 = arith.constant 2 : index
    %c0_37 = arith.constant 0 : index
    %48 = vector.load %arg8[%c1_35, %c2_36, %c0_37] : memref<18x18x4xf32, #tpu.memory_space<vmem>>, vector<16x16x4xf32>
    %49 = vector.extract_strided_slice %6 {offsets = [5, 0], sizes = [1, 4], strides = [1, 1]} : vector<9x4xf32> to vector<1x4xf32>
    %50 = vector.shape_cast %49 : vector<1x4xf32> to vector<4xf32>
    %51 = vector.shape_cast %50 : vector<4xf32> to vector<1x1x4xf32>
    %52 = vector.broadcast %51 : vector<1x1x4xf32> to vector<16x16x4xf32>
    %53 = arith.mulf %48, %52 : vector<16x16x4xf32>
    %54 = arith.addf %47, %53 : vector<16x16x4xf32>
    %c2_38 = arith.constant 2 : index
    %c0_39 = arith.constant 0 : index
    %c0_40 = arith.constant 0 : index
    %55 = vector.load %arg8[%c2_38, %c0_39, %c0_40] : memref<18x18x4xf32, #tpu.memory_space<vmem>>, vector<16x16x4xf32>
    %56 = vector.extract_strided_slice %6 {offsets = [6, 0], sizes = [1, 4], strides = [1, 1]} : vector<9x4xf32> to vector<1x4xf32>
    %57 = vector.shape_cast %56 : vector<1x4xf32> to vector<4xf32>
    %58 = vector.shape_cast %57 : vector<4xf32> to vector<1x1x4xf32>
    %59 = vector.broadcast %58 : vector<1x1x4xf32> to vector<16x16x4xf32>
    %60 = arith.mulf %55, %59 : vector<16x16x4xf32>
    %61 = arith.addf %54, %60 : vector<16x16x4xf32>
    %c2_41 = arith.constant 2 : index
    %c1_42 = arith.constant 1 : index
    %c0_43 = arith.constant 0 : index
    %62 = vector.load %arg8[%c2_41, %c1_42, %c0_43] : memref<18x18x4xf32, #tpu.memory_space<vmem>>, vector<16x16x4xf32>
    %63 = vector.extract_strided_slice %6 {offsets = [7, 0], sizes = [1, 4], strides = [1, 1]} : vector<9x4xf32> to vector<1x4xf32>
    %64 = vector.shape_cast %63 : vector<1x4xf32> to vector<4xf32>
    %65 = vector.shape_cast %64 : vector<4xf32> to vector<1x1x4xf32>
    %66 = vector.broadcast %65 : vector<1x1x4xf32> to vector<16x16x4xf32>
    %67 = arith.mulf %62, %66 : vector<16x16x4xf32>
    %68 = arith.addf %61, %67 : vector<16x16x4xf32>
    %c2_44 = arith.constant 2 : index
    %c2_45 = arith.constant 2 : index
    %c0_46 = arith.constant 0 : index
    %69 = vector.load %arg8[%c2_44, %c2_45, %c0_46] : memref<18x18x4xf32, #tpu.memory_space<vmem>>, vector<16x16x4xf32>
    %70 = vector.extract_strided_slice %6 {offsets = [8, 0], sizes = [1, 4], strides = [1, 1]} : vector<9x4xf32> to vector<1x4xf32>
    %71 = vector.shape_cast %70 : vector<1x4xf32> to vector<4xf32>
    %72 = vector.shape_cast %71 : vector<4xf32> to vector<1x1x4xf32>
    %73 = vector.broadcast %72 : vector<1x1x4xf32> to vector<16x16x4xf32>
    %74 = arith.mulf %69, %73 : vector<16x16x4xf32>
    %75 = arith.addf %68, %74 : vector<16x16x4xf32>
    %76 = vector.shape_cast %75 : vector<16x16x4xf32> to vector<256x4xf32>
    %c0_47 = arith.constant 0 : index
    %c0_48 = arith.constant 0 : index
    %77 = vector.load %arg9[%c0_47, %c0_48] : memref<256x4xf32, #tpu.memory_space<vmem>>, vector<256x4xf32>
    tpu.vector_store %arg9[%c0_47, %c0_48], %76 {strides = array<i32>} : memref<256x4xf32, #tpu.memory_space<vmem>>, vector<256x4xf32>,
    %c0_49 = arith.constant 0 : index
    %c0_50 = arith.constant 0 : index
    %78 = vector.load %arg9[%c0_49, %c0_50] : memref<256x4xf32, #tpu.memory_space<vmem>>, vector<256x4xf32>
    %c0_51 = arith.constant 0 : index
    %c0_52 = arith.constant 0 : index
    %79 = vector.load %arg5[%c0_51, %c0_52] : memref<4x4xf32, #tpu.memory_space<vmem>>, vector<4x4xf32>
    %cst_53 = arith.constant dense<0.000000e+00> : vector<256x4xf32>
    %80 = tpu.matmul %78, %79, %cst_53 {dimension_numbers = #tpu.dot_dimension_numbers<[1], [0], [0], [1], [0, 0, 1, 1], [], []>} : vector<256x4xf32>, vector<4x4xf32>, vector<256x4xf32> -> vector<256x4xf32>
    %81 = vector.shape_cast %80 : vector<256x4xf32> to vector<1x16x16x4xf32>
    %c0_54 = arith.constant 0 : index
    %c0_55 = arith.constant 0 : index
    %c0_56 = arith.constant 0 : index
    %c0_57 = arith.constant 0 : index
    %82 = vector.load %arg6[%c0_54, %c0_55, %c0_56, %c0_57] : memref<1x16x16x4xf32, #tpu.memory_space<vmem>>, vector<1x16x16x4xf32>
    tpu.vector_store %arg6[%c0_54, %c0_55, %c0_56, %c0_57], %81 {strides = array<i32>} : memref<1x16x16x4xf32, #tpu.memory_space<vmem>>, vector<1x16x16x4xf32>,
    %cst_58 = arith.constant dense<0.000000e+00> : vector<4xf32>
    %83 = vector.multi_reduction <add>, %80, %cst_58 [0] : vector<256x4xf32> to vector<4xf32>
    %84 = vector.shape_cast %83 : vector<4xf32> to vector<1x4xf32>
    %c0_59 = arith.constant 0 : index
    %c0_60 = arith.constant 0 : index
    %c0_61 = arith.constant 0 : index
    %85 = vector.load %arg7[%c0_59, %c0_60, %c0_61] : memref<1x2x4xf32, #tpu.memory_space<vmem>>, vector<1x1x4xf32>
    %86 = vector.shape_cast %85 : vector<1x1x4xf32> to vector<1x4xf32>
    %87 = vector.shape_cast %84 : vector<1x4xf32> to vector<1x1x4xf32>
    tpu.vector_store %arg7[%c0_59, %c0_60, %c0_61], %87 {strides = array<i32>} : memref<1x2x4xf32, #tpu.memory_space<vmem>>, vector<1x1x4xf32>,
    %88 = arith.mulf %80, %80 : vector<256x4xf32>
    %cst_62 = arith.constant dense<0.000000e+00> : vector<4xf32>
    %89 = vector.multi_reduction <add>, %88, %cst_62 [0] : vector<256x4xf32> to vector<4xf32>
    %90 = vector.shape_cast %89 : vector<4xf32> to vector<1x4xf32>
    %c0_63 = arith.constant 0 : index
    %c1_64 = arith.constant 1 : index
    %c0_65 = arith.constant 0 : index
    %91 = vector.load %arg7[%c0_63, %c1_64, %c0_65] : memref<1x2x4xf32, #tpu.memory_space<vmem>>, vector<1x1x4xf32>
    %92 = vector.shape_cast %91 : vector<1x1x4xf32> to vector<1x4xf32>
    %93 = vector.shape_cast %90 : vector<1x4xf32> to vector<1x1x4xf32>
    tpu.vector_store %arg7[%c0_63, %c1_64, %c0_65], %93 {strides = array<i32>} : memref<1x2x4xf32, #tpu.memory_space<vmem>>, vector<1x1x4xf32>,
    return
  }
  func.func @transform_0(%arg0: i32) -> (i32, i32, i32, i32) {
    %c0_i32 = arith.constant 0 : i32
    %c0_i32_0 = arith.constant 0 : i32
    %c0_i32_1 = arith.constant 0 : i32
    %c0_i32_2 = arith.constant 0 : i32
    return %arg0, %c0_i32, %c0_i32_0, %c0_i32_1 : i32, i32, i32, i32
  }
  func.func @transform_1(%arg0: i32) -> (i32, i32) {
    %c0_i32 = arith.constant 0 : i32
    %c0_i32_0 = arith.constant 0 : i32
    %c0_i32_1 = arith.constant 0 : i32
    return %c0_i32, %c0_i32_0 : i32, i32
  }
  func.func @transform_2(%arg0: i32) -> (i32, i32) {
    %c0_i32 = arith.constant 0 : i32
    %c0_i32_0 = arith.constant 0 : i32
    %c0_i32_1 = arith.constant 0 : i32
    return %c0_i32, %c0_i32_0 : i32, i32
  }
  func.func @transform_3(%arg0: i32) -> (i32, i32) {
    %c0_i32 = arith.constant 0 : i32
    %c0_i32_0 = arith.constant 0 : i32
    %c0_i32_1 = arith.constant 0 : i32
    return %c0_i32, %c0_i32_0 : i32, i32
  }
  func.func @transform_4(%arg0: i32) -> (i32, i32) {
    %c0_i32 = arith.constant 0 : i32
    %c0_i32_0 = arith.constant 0 : i32
    %c0_i32_1 = arith.constant 0 : i32
    return %c0_i32, %c0_i32_0 : i32, i32
  }
  func.func @transform_5(%arg0: i32) -> (i32, i32, i32, i32) {
    %c0_i32 = arith.constant 0 : i32
    %c0_i32_0 = arith.constant 0 : i32
    %c0_i32_1 = arith.constant 0 : i32
    %c0_i32_2 = arith.constant 0 : i32
    return %arg0, %c0_i32, %c0_i32_0, %c0_i32_1 : i32, i32, i32, i32
  }
  func.func @transform_6(%arg0: i32) -> (i32, i32, i32) {
    %c0_i32 = arith.constant 0 : i32
    %c0_i32_0 = arith.constant 0 : i32
    %c0_i32_1 = arith.constant 0 : i32
    return %arg0, %c0_i32, %c0_i32_0 : i32, i32, i32
  }
}

</mosaic_0001>

<bundles_post_ra>
// kernel: tpu_custom_call.1
= control target key start
LH: loop header
LB: loop body
LE: loop exit
PB: predicated region body
PF: predicated region fallthrough
CT: control target
= control target key end

     0   :  { %12 = vsyncpa [#allocation5], 0  ;;  %s3360_s0 = inlined_call_operand.vmem [shape: f32[2,16,16,4], index: 0, kind: input, shape index: {}]   ;;  %s3361_s1 = inlined_call_operand.vmem [shape: f32[1,4], index: 1, kind: input, shape index: {}]   ;;  %s3362_s2 = inlined_call_operand.vmem [shape: f32[1,4], index: 2, kind: input, shape index: {}]   ;;  %s3363_s3 = inlined_call_operand.vmem [shape: f32[9,4], index: 3, kind: input, shape index: {}]   ;;  %s3364_s4 = inlined_call_operand.vmem [shape: f32[4,4], index: 4, kind: input, shape index: {}]   ;;  %s3365_s5 = inlined_call_operand.vmem [shape: f32[2,16,16,4], index: 5, kind: output, shape index: {0}]   ;;  %s3366_s6 = inlined_call_operand.hbm [shape: f32[2,2,4], index: 6, kind: output, shape index: {1}]  }
   0x1   :  { %14 = vsyncpa [#allocation5 + $0x1], 0  ;;  %s2281_s21 = smov 0   ;;  %s2283_s1 = smov 0  }
   0x2   :  { %s2285_s22 = smov 0   ;;  %s2287_s2 = smov 0  }
   0x3 LB: > { %s2302_s23 = sadd.s32 4294967295, %s2242_s2   ;;  %s2005_s24 = sadd.s32 4294967294, %s2242_s2   ;;  %s2242_s2 = sphi %s2287_s2, %s3372_s2   ;;  %s2238_s22 = sphi %s2285_s22, %s3371_s22   ;;  %s2234_s1 = sphi %s2283_s1, %s3370_s1   ;;  %s2230_s21 = sphi %s2281_s21, %s3369_s21  }
   0x4   : > { %s2306_s25 = sadd.s32 1, %s2242_s2   ;;  %s163_s26 = sadd.s32 1, %s2238_s22 }
   0x5   : > { %s160_s27 = ssub.s32 %s2242_s2, %s2306_s25  ;;  %p173_p0 = scmp.ne.s32.totalorder %s2238_s22, %s2234_s1 }
   0x6   : > { %p161_p1 = scmp.eq.s32.totalorder %s160_s27, 0  ;;  %p174_p2 = scmp.eq.s32.totalorder %s2302_s23, 1 }
   0x7   : > { %p179_p3 = scmp.ne.s32.totalorder %s2234_s1, %s2230_s21  ;;  %p180_p4 = scmp.eq.s32.totalorder %s2005_s24, 1 }
   0x8   : > { %s2317_s28 = scalar_select %p161_p1, %s2238_s22, %s163_s26  }
   0x9   : > { %p2319_p5 = por %p174_p2, %p173_p0  ;;  %p2323_p6 = por %p180_p4, %p179_p3 }
   0xa   : > { %p2008_p7 = scmp.ge.s32.totalorder %s2242_s2, 1  ;;  %p218_p8 = scmp.lt.s32.totalorder %s2242_s2, 3 }
   0xc   : > { %p219_p9 = pnand %p2008_p7, %p218_p8 }
   0xd   : > { %v1369_v0 = vld [vmem:[%s3364_s4] sm:$0xf] (!%p219_p9)  ;;  %vm1466_vm0 = vcmask (!%p219_p9), 1043456   ;;  %p253_p10 = scmp.lt.s32.totalorder (!%p219_p9), %s2302_s23, 1  ;;  %vm263_vm1 = vcmask (!%p219_p9), 31744   ;;  %v436_v1 = vlaneseq (!%p219_p9)  ;;  %v2244_v2 = vmov (!%p219_p9), 0.0  }
   0xe   : > { %222 = sbr.rel (%p219_p9) target bundleno = 443 (0x1bb), region = 40  ;;  %2087 = vmatprep.subr.msk.mxu0 (!%p219_p9), %vm1466_vm0, %v1369_v0  ;;  %264 = vst.msk [vmem:[#allocation2] sm:$0xff] (!%p219_p9), %vm263_vm1, %v2244_v2  ;;  %265 = vst.msk [vmem:[#allocation2 + $0x8] sm:$0xff] (!%p219_p9), %vm263_vm1, %v2244_v2  ;;  %vm273_vm2 = vcmask (!%p219_p9), 24576   ;;  %vm266_vm3 = vcmask (!%p219_p9), 25600   ;;  %2137 = vmatprep.subr.msk.mxu1 (!%p219_p9), %vm1466_vm0, %v1369_v0  ;;  %v2383_v4 = vld [vmem:[%s3363_s3] sm:$0xff] (!%p219_p9) }
   0xf   : > { %269 = vst.msk [vmem:[#allocation2 + $0x198] sm:$0xff] (!%p219_p9), %vm263_vm1, %v2244_v2  ;;  %270 = vst.msk [vmem:[#allocation2 + $0x1a0] sm:$0xff] (!%p219_p9), %vm263_vm1, %v2244_v2  ;;  %2088 = vmatpush3.msk.msra.mxu0 (!%p219_p9), %vm1466_vm0, %v1369_v0  ;;  %v2345_v3 = vshrl.u32 (!%p219_p9), %v436_v1, 7  ;;  %2138 = vmatpush3.msk.msra.mxu1 (!%p219_p9), %vm1466_vm0, %v1369_v0  ;;  %s250_s27 = sand.u32 (!%p219_p9), 1, %s2234_s1   ;;  %s2049_s8 = sshll.u32 (!%p219_p9), %s2302_s23, 5 }
  0x10   : > { %274 = vst.msk [vmem:[#allocation2 + $0x18] sm:$0x1] (!%p219_p9), %vm273_vm2, %v2244_v2  ;;  %275 = vst.msk [vmem:[#allocation2 + $0x30] sm:$0x1] (!%p219_p9), %vm273_vm2, %v2244_v2  ;;  %s2009_s7 = sshll.u32 (!%p219_p9), %s250_s27, 1  ;;  %s3317_s13 = scalar_lea.hbm (!%p219_p9), %s3366_s6, %s2049_s8 }
  0x11   : > { %276 = vst.msk [vmem:[#allocation2 + $0x48] sm:$0x1] (!%p219_p9), %vm273_vm2, %v2244_v2  ;;  %277 = vst.msk [vmem:[#allocation2 + $0x60] sm:$0x1] (!%p219_p9), %vm273_vm2, %v2244_v2  ;;  %v438_v5 = vsub.s32 (!%p219_p9), 0, %v2345_v3  ;;  %v538_v6 = vsub.s32 (!%p219_p9), 1, %v2345_v3 }
  0x12   : > { %278 = vst.msk [vmem:[#allocation2 + $0x78] sm:$0x1] (!%p219_p9), %vm273_vm2, %v2244_v2  ;;  %279 = vst.msk [vmem:[#allocation2 + $0x90] sm:$0x1] (!%p219_p9), %vm273_vm2, %v2244_v2  ;;  %v638_v7 = vsub.s32 (!%p219_p9), 2, %v2345_v3  ;;  %v738_v8 = vsub.s32 (!%p219_p9), 3, %v2345_v3 }
  0x13   : > { %280 = vst.msk [vmem:[#allocation2 + $0xa8] sm:$0x1] (!%p219_p9), %vm273_vm2, %v2244_v2  ;;  %281 = vst.msk [vmem:[#allocation2 + $0xc0] sm:$0x1] (!%p219_p9), %vm273_vm2, %v2244_v2  ;;  %v838_v9 = vsub.s32 (!%p219_p9), 4, %v2345_v3  ;;  %v938_v10 = vsub.s32 (!%p219_p9), 5, %v2345_v3  ;;  %v2404_v15 = vrot.slane (!%p219_p9), %v2383_v4, %v438_v5  ;;  %v2407_v16 = vrot.slane (!%p219_p9), %v2383_v4, %v538_v6 }
  0x14   : > { %282 = vst.msk [vmem:[#allocation2 + $0xd8] sm:$0x1] (!%p219_p9), %vm273_vm2, %v2244_v2  ;;  %283 = vst.msk [vmem:[#allocation2 + $0xf0] sm:$0x1] (!%p219_p9), %vm273_vm2, %v2244_v2  ;;  %v1039_v11 = vsub.s32 (!%p219_p9), 6, %v2345_v3  ;;  %v2410_v17 = vrot.slane (!%p219_p9), %v2383_v4, %v638_v7  ;;  %v1139_v18 = vsub.s32 (!%p219_p9), 7, %v2345_v3  ;;  %v2417_v29 = vrot.slane (!%p219_p9), %v2383_v4, %v738_v8 }
  0x15   : > { %s2341_s9 = scalar_select %p253_p10, %s2302_s23, 1  ;;  %284 = vst.msk [vmem:[#allocation2 + $0x108] sm:$0x1] %vm273_vm2, %v2244_v2  ;;  %285 = vst.msk [vmem:[#allocation2 + $0x120] sm:$0x1] %vm273_vm2, %v2244_v2  ;;  %v404_v26 = vld [vmem:[#allocation2] sm:$0xff]  ;;  %v2420_v30 = vrot.slane %v2383_v4, %v838_v9  ;;  %v2423_v31 = vrot.slane %v2383_v4, %v938_v10 }
  0x16   : > { %286 = vst.msk [vmem:[#allocation2 + $0x138] sm:$0x1] %vm273_vm2, %v2244_v2  ;;  %287 = vst.msk [vmem:[#allocation2 + $0x150] sm:$0x1] %vm273_vm2, %v2244_v2  ;;  %v504_v27 = vld [vmem:[#allocation2 + $0x1] sm:$0xff]  ;;  %v440_v32 = vmul.f32 %v2404_v15, %v404_v26  ;;  %v2431_v34 = vrot.slane %v2383_v4, %v1039_v11  ;;  %v2456_v3 = vrot.slane %v2383_v4, %v1139_v18  ;;  %s1905_s23 = scalar_lea.sflag [#allocation5], %s250_s27 }
  0x17   : > { %288 = vst.msk [vmem:[#allocation2 + $0x168] sm:$0x1] %vm273_vm2, %v2244_v2  ;;  %289 = vst.msk [vmem:[#allocation2 + $0x180] sm:$0x1] %vm273_vm2, %v2244_v2  ;;  %s2052_s12 = sshll.u32 %s2341_s9, 8  ;;  %v604_v28 = vld [vmem:[#allocation2 + $0x2] sm:$0xff]  ;;  %v540_v33 = vmul.f32 %v2407_v16, %v504_v27 }
  0x18   : > { %290 = vst.msk [vmem:[#allocation2 + $0x29] sm:$0x1] %vm273_vm2, %v2244_v2  ;;  %291 = vst.msk [vmem:[#allocation2 + $0x41] sm:$0x1] %vm273_vm2, %v2244_v2  ;;  %s2395_s15 = scalar_lea.vmem %s3360_s0, %s2052_s12  ;;  %v405_v35 = vld [vmem:[#allocation2 + $0x8] sm:$0xff]  ;;  %v640_v39 = vmul.f32 %v2410_v17, %v604_v28  ;;  %s3181_s26 = scalar_lea.vmem %s3365_s5, %s2052_s12 }
  0x19   : > { %292 = vst.msk [vmem:[#allocation2 + $0x59] sm:$0x1] %vm273_vm2, %v2244_v2  ;;  %293 = vst.msk [vmem:[#allocation2 + $0x71] sm:$0x1] %vm273_vm2, %v2244_v2  ;;  %v308_v12 = vld [vmem:[%s2395_s15] sm:$0xff]  ;;  %v309_v13 = vld [vmem:[%s2395_s15 + $0x8] sm:$0xff]  ;;  %v441_v40 = vmul.f32 %v2404_v15, %v405_v35  ;;  %v572_v46 = vadd.f32 %v540_v33, %v440_v32 }
  0x1a   : > { %294 = vst.msk [vmem:[#allocation2 + $0x89] sm:$0x1] %vm273_vm2, %v2244_v2  ;;  %295 = vst.msk [vmem:[#allocation2 + $0xa1] sm:$0x1] %vm273_vm2, %v2244_v2  ;;  %v310_v14 = vld [vmem:[%s2395_s15 + $0x10] sm:$0xff]  ;;  %v311_v19 = vld [vmem:[%s2395_s15 + $0x18] sm:$0xff] }
  0x1b   : > { %296 = vst.msk [vmem:[#allocation2 + $0xb9] sm:$0x1] %vm273_vm2, %v2244_v2  ;;  %297 = vst.msk [vmem:[#allocation2 + $0xd1] sm:$0x1] %vm273_vm2, %v2244_v2  ;;  %v340_v20 = vmax.f32 %v308_v12, 0.0  ;;  %v341_v21 = vmax.f32 %v309_v13, 0.0  ;;  %v672_v11 = vadd.f32 %v640_v39, %v572_v46 }
  0x1c   : > { %298 = vst.msk [vmem:[#allocation2 + $0xe9] sm:$0x1] %vm273_vm2, %v2244_v2  ;;  %299 = vst.msk [vmem:[#allocation2 + $0x101] sm:$0x1] %vm273_vm2, %v2244_v2  ;;  %v342_v22 = vmax.f32 %v310_v14, 0.0  ;;  %v312_v23 = vld [vmem:[%s2395_s15 + $0x20] sm:$0xff] }
  0x1d   : > { %300 = vst.msk [vmem:[#allocation2 + $0x119] sm:$0x1] %vm273_vm2, %v2244_v2  ;;  %301 = vst.msk [vmem:[#allocation2 + $0x131] sm:$0x1] %vm273_vm2, %v2244_v2  ;;  %v313_v24 = vld [vmem:[%s2395_s15 + $0x28] sm:$0xff]  ;;  %v343_v25 = vmax.f32 %v311_v19, 0.0 }
  0x1e   : > { %302 = vst.msk [vmem:[#allocation2 + $0x149] sm:$0x1] %vm273_vm2, %v2244_v2  ;;  %303 = vst.msk [vmem:[#allocation2 + $0x161] sm:$0x1] %vm273_vm2, %v2244_v2  ;;  %v344_v38 = vmax.f32 %v312_v23, 0.0  ;;  %v345_v42 = vmax.f32 %v313_v24, 0.0 }
  0x1f   : > { %304 = vst.msk [vmem:[#allocation2 + $0x179] sm:$0x1] %vm273_vm2, %v2244_v2  ;;  %305 = vst.msk [vmem:[#allocation2 + $0x191] sm:$0x1] %vm273_vm2, %v2244_v2  ;;  %v314_v43 = vld [vmem:[%s2395_s15 + $0x30] sm:$0xff]  ;;  %v315_v44 = vld [vmem:[%s2395_s15 + $0x38] sm:$0xff] }
  0x20   : > { %267 = vst.msk [vmem:[#allocation2 + $0x10] sm:$0x3] %vm266_vm3, %v2244_v2  ;;  %271 = vst.msk [vmem:[#allocation2 + $0x1a8] sm:$0x3] %vm266_vm3, %v2244_v2  ;;  %v316_v45 = vld [vmem:[%s2395_s15 + $0x40] sm:$0xff]  ;;  %v346_v47 = vmax.f32 %v314_v43, 0.0 }
  0x21   : > { %372 = vst.msk [vmem:[#allocation2 + $0x19] sm:$0xff] %vm263_vm1, %v340_v20  ;;  %373 = vst.msk [vmem:[#allocation2 + $0x21] sm:$0xff] %vm263_vm1, %v341_v21  ;;  %v347_v48 = vmax.f32 %v315_v44, 0.0  ;;  %v317_v49 = vld [vmem:[%s2395_s15 + $0x48] sm:$0xff]  ;;  %v348_v50 = vmax.f32 %v316_v45, 0.0  ;;  %v318_v51 = vld [vmem:[%s2395_s15 + $0x50] sm:$0xff] }
  0x22   : > { %374 = vst.msk [vmem:[#allocation2 + $0x31] sm:$0xff] %vm263_vm1, %v342_v22  ;;  %375 = vst.msk [vmem:[#allocation2 + $0x39] sm:$0xff] %vm263_vm1, %v343_v25  ;;  %v319_v52 = vld [vmem:[%s2395_s15 + $0x58] sm:$0xff]  ;;  %v349_v54 = vmax.f32 %v317_v49, 0.0  ;;  %v350_v55 = vmax.f32 %v318_v51, 0.0  ;;  %v320_v57 = vld [vmem:[%s2395_s15 + $0x60] sm:$0xff] }
  0x23   : > { %376 = vst.msk [vmem:[#allocation2 + $0x49] sm:$0xff] %vm263_vm1, %v344_v38  ;;  %377 = vst.msk [vmem:[#allocation2 + $0x51] sm:$0xff] %vm263_vm1, %v345_v42  ;;  %v351_v56 = vmax.f32 %v319_v52, 0.0  ;;  %v321_v58 = vld [vmem:[%s2395_s15 + $0x68] sm:$0xff]  ;;  %v322_v59 = vld [vmem:[%s2395_s15 + $0x70] sm:$0xff]  ;;  %v352_v61 = vmax.f32 %v320_v57, 0.0 }
  0x24   : > { %378 = vst.msk [vmem:[#allocation2 + $0x61] sm:$0xff] %vm263_vm1, %v346_v47  ;;  %379 = vst.msk [vmem:[#allocation2 + $0x69] sm:$0xff] %vm263_vm1, %v347_v48  ;;  %v353_v62 = vmax.f32 %v321_v58, 0.0  ;;  %v323_v63 = vld [vmem:[%s2395_s15 + $0x78] sm:$0xff]  ;;  %v354_v0 = vmax.f32 %v322_v59, 0.0  ;;  %v324_v1 = vld [vmem:[%s2395_s15 + $0x80] sm:$0xff] }
  0x25   : > { %380 = vst.msk [vmem:[#allocation2 + $0x79] sm:$0xff] %vm263_vm1, %v348_v50  ;;  %v325_v2 = vld [vmem:[%s2395_s15 + $0x88] sm:$0xff]  ;;  %381 = vst.msk [vmem:[#allocation2 + $0x81] sm:$0xff] %vm263_vm1, %v349_v54  ;;  %v355_v5 = vmax.f32 %v323_v63, 0.0  ;;  %v356_v6 = vmax.f32 %v324_v1, 0.0  ;;  %v326_v8 = vld [vmem:[%s2395_s15 + $0x90] sm:$0xff] }
  0x26   : > { %382 = vst.msk [vmem:[#allocation2 + $0x91] sm:$0xff] %vm263_vm1, %v350_v55  ;;  %383 = vst.msk [vmem:[#allocation2 + $0x99] sm:$0xff] %vm263_vm1, %v351_v56  ;;  %v357_v7 = vmax.f32 %v325_v2, 0.0  ;;  %v327_v9 = vld [vmem:[%s2395_s15 + $0x98] sm:$0xff]  ;;  %v328_v10 = vld [vmem:[%s2395_s15 + $0xa0] sm:$0xff]  ;;  %v358_v4 = vmax.f32 %v326_v8, 0.0 }
  0x27   : > { %v505_v36 = vld [vmem:[#allocation2 + $0x9] sm:$0xff]  ;;  %384 = vst.msk [vmem:[#allocation2 + $0xa9] sm:$0xff] %vm263_vm1, %v352_v61  ;;  %385 = vst.msk [vmem:[#allocation2 + $0xb1] sm:$0xff] %vm263_vm1, %v353_v62  ;;  %v359_v12 = vmax.f32 %v327_v9, 0.0  ;;  %v360_v14 = vmax.f32 %v328_v10, 0.0  ;;  %v331_v19 = vld [vmem:[%s2395_s15 + $0xb8] sm:$0xff] }
  0x28   : > { %v605_v37 = vld [vmem:[#allocation2 + $0xa] sm:$0xff]  ;;  %v541_v41 = vmul.f32 %v2407_v16, %v505_v36  ;;  %386 = vst.msk [vmem:[#allocation2 + $0xc1] sm:$0xff] %vm263_vm1, %v354_v0  ;;  %v704_v20 = vld [vmem:[#allocation2 + $0x18] sm:$0xff]  ;;  %387 = vst.msk [vmem:[#allocation2 + $0xc9] sm:$0xff] %vm263_vm1, %v355_v5  ;;  %v363_v24 = vmax.f32 %v331_v19, 0.0  ;;  %s252_s9 = scalar_lea.vmem [#allocation4], %s2009_s7 }
  0x29   : > { %v641_v53 = vmul.f32 %v2410_v17, %v605_v37  ;;  %v329_v13 = vld [vmem:[%s2395_s15 + $0xa8] sm:$0xff]  ;;  %v330_v18 = vld [vmem:[%s2395_s15 + $0xb0] sm:$0xff]  ;;  %v804_v21 = vld [vmem:[#allocation2 + $0x19] sm:$0xff]  ;;  %388 = vst.msk [vmem:[#allocation2 + $0xd9] sm:$0xff] %vm263_vm1, %v356_v6  ;;  %v740_v26 = vmul.f32 %v2417_v29, %v704_v20  ;;  %v442_v35 = vmul.f32 %v704_v20, %v2404_v15  ;;  %s1921_s10 = sshll.u32 %s252_s9, 4  ;;  %s3319_s10 = int_to_ptr.vmem [resolvable:$true] %s1921_s10 }
  0x2a   : > { %v573_v60 = vadd.f32 %v541_v41, %v441_v40  ;;  %389 = vst.msk [vmem:[#allocation2 + $0xe1] sm:$0xff] %vm263_vm1, %v357_v7  ;;  %v361_v22 = vmax.f32 %v329_v13, 0.0  ;;  %v362_v23 = vmax.f32 %v330_v18, 0.0  ;;  %v2476_v25 = vld [vmem:[%s3363_s3 + $0x8] ss:$0 sm:$0xff]  ;;  %v840_v27 = vmul.f32 %v2420_v30, %v804_v21  ;;  %v904_v28 = vld [vmem:[#allocation2 + $0x1a] sm:$0xff] }
  0x2b   : > { %v1005_v32 = vld [vmem:[#allocation2 + $0x30] sm:$0xff]  ;;  %390 = vst.msk [vmem:[#allocation2 + $0xf1] sm:$0xff] %vm263_vm1, %v358_v4  ;;  %391 = vst.msk [vmem:[#allocation2 + $0xf9] sm:$0xff] %vm263_vm1, %v359_v12  ;;  %v940_v36 = vmul.f32 %v2423_v31, %v904_v28  ;;  %v705_v39 = vld [vmem:[#allocation2 + $0x20] sm:$0xff]  ;;  %v542_v41 = vmul.f32 %v804_v21, %v2407_v16  ;;  %v772_v42 = vadd.f32 %v740_v26, %v672_v11  ;;  %s2180_s14 = scalar_lea.vmem %s3319_s10, 32 }
  0x2c   : > { %v673_v33 = vadd.f32 %v641_v53, %v573_v60  ;;  %392 = vst.msk [vmem:[#allocation2 + $0x109] sm:$0xff] %vm263_vm1, %v360_v14  ;;  %v1041_v37 = vmul.f32 %v2431_v34, %v1005_v32  ;;  %v1105_v38 = vld [vmem:[#allocation2 + $0x31] sm:$0xff]  ;;  %v805_v40 = vld [vmem:[#allocation2 + $0x21] sm:$0xff]  ;;  %393 = vst.msk [vmem:[#allocation2 + $0x111] sm:$0xff] %vm263_vm1, %v361_v22  ;;  %v741_v45 = vmul.f32 %v2417_v29, %v705_v39  ;;  %p2181_p11 = scmp.ne.s32.totalorder %s3319_s10, %s2180_s14 }
  0x2d   : > { %394 = vst.msk [vmem:[#allocation2 + $0x121] sm:$0xff] %vm263_vm1, %v362_v23  ;;  %395 = vst.msk [vmem:[#allocation2 + $0x129] sm:$0xff] %vm263_vm1, %v363_v24  ;;  %v1141_v43 = vmul.f32 %v2456_v3, %v1105_v38  ;;  %v1205_v44 = vld [vmem:[#allocation2 + $0x32] sm:$0xff]  ;;  %v841_v46 = vmul.f32 %v2420_v30, %v805_v40  ;;  %v905_v47 = vld [vmem:[#allocation2 + $0x22] sm:$0xff]  ;;  %v574_v52 = vadd.f32 %v542_v41, %v442_v35 }
  0x2e   : > { %v2493_v48 = vld [vmem:[#allocation2 + $0x38] sm:$0xff]  ;;  %v1241_v49 = vmul.f32 %v2476_v25, %v1205_v44  ;;  %v941_v50 = vmul.f32 %v2423_v31, %v905_v47  ;;  %v872_v53 = vadd.f32 %v840_v27, %v772_v42  ;;  %v773_v54 = vadd.f32 %v741_v45, %v673_v33  ;;  %v2505_v63 = vld [vmem:[#allocation2 + $0x48] sm:$0xff]  ;;  %v2524_v22 = vld [vmem:[#allocation2 + $0x50] sm:$0xff]  ;;  %p2182_p12 = pnand %p2181_p11, %p2319_p5 }
  0x2f   : > { %v1042_v51 = vmul.f32 %v2431_v34, %v2493_v48  ;;  %v1106_v55 = vld [vmem:[#allocation2 + $0x39] sm:$0xff]  ;;  %v642_v57 = vmul.f32 %v904_v28, %v2410_v17  ;;  %v742_v58 = vmul.f32 %v1005_v32, %v2417_v29  ;;  %v842_v61 = vmul.f32 %v1105_v38, %v2420_v30  ;;  %v2509_v6 = vld [vmem:[#allocation2 + $0x49] sm:$0xff]  ;;  %v2528_v33 = vld [vmem:[#allocation2 + $0x51] sm:$0xff] }
  0x30   : > { %v1206_v56 = vld [vmem:[#allocation2 + $0x3a] sm:$0xff]  ;;  %v1142_v59 = vmul.f32 %v2456_v3, %v1106_v55  ;;  %v942_v62 = vmul.f32 %v1205_v44, %v2423_v31  ;;  %v972_v0 = vadd.f32 %v940_v36, %v872_v53  ;;  %v873_v1 = vadd.f32 %v841_v46, %v773_v54  ;;  %v2513_v8 = vld [vmem:[#allocation2 + $0x4a] sm:$0xff]  ;;  %p2183_p13 = pneg %p2182_p12 }
  0x31   : > { %v1242_v60 = vmul.f32 %v2476_v25, %v1206_v56  ;;  %v674_v2 = vadd.f32 %v642_v57, %v574_v52  ;;  %v1043_v5 = vmul.f32 %v2431_v34, %v2505_v63  ;;  %v1143_v7 = vmul.f32 %v2456_v3, %v2509_v6  ;;  %v2550_v57 = vld [vmem:[#allocation2 + $0x61] sm:$0xff] }
  0x32   : > { %v443_v9 = vmul.f32 %v705_v39, %v2404_v15  ;;  %v543_v10 = vmul.f32 %v805_v40, %v2407_v16  ;;  %v643_v11 = vmul.f32 %v905_v47, %v2410_v17  ;;  %v1073_v4 = vadd.f32 %v1041_v37, %v972_v0 }
  0x33   : > { %v973_v12 = vadd.f32 %v941_v50, %v873_v1  ;;  %v774_v13 = vadd.f32 %v742_v58, %v674_v2  ;;  %v1243_v14 = vmul.f32 %v2476_v25, %v2513_v8  ;;  %v743_v19 = vmul.f32 %v2493_v48, %v2417_v29 }
  0x34   : > { %v575_v18 = vadd.f32 %v543_v10, %v443_v9  ;;  %v843_v20 = vmul.f32 %v1106_v55, %v2420_v30  ;;  %v943_v21 = vmul.f32 %v1206_v56, %v2423_v31  ;;  %v1173_v23 = vadd.f32 %v1141_v43, %v1073_v4  ;;  %v2535_v43 = vld [vmem:[#allocation2 + $0x52] sm:$0xff]  ;;  %v2569_v4 = vld [vmem:[#allocation2 + $0x68] sm:$0xff] }
  0x35   : > { %v1074_v24 = vadd.f32 %v1042_v51, %v973_v12  ;;  %v874_v26 = vadd.f32 %v842_v61, %v774_v13  ;;  %v1044_v27 = vmul.f32 %v2431_v34, %v2524_v22  ;;  %v444_v35 = vmul.f32 %v1005_v32, %v2404_v15  ;;  %v2546_v51 = vld [vmem:[#allocation2 + $0x60] sm:$0xff]  ;;  %v2573_v13 = vld [vmem:[#allocation2 + $0x69] sm:$0xff] }
  0x36   : > { %v675_v28 = vadd.f32 %v643_v11, %v575_v18  ;;  %v544_v36 = vmul.f32 %v1105_v38, %v2407_v16  ;;  %v644_v37 = vmul.f32 %v1205_v44, %v2410_v17  ;;  %v1273_v39 = vadd.f32 %v1241_v49, %v1173_v23  ;;  %v2557_v61 = vld [vmem:[#allocation2 + $0x62] sm:$0xff] }
  0x37   : > { %v1174_v40 = vadd.f32 %v1142_v59, %v1074_v24  ;;  %v974_v41 = vadd.f32 %v942_v62, %v874_v26  ;;  %v1144_v42 = vmul.f32 %v2456_v3, %v2528_v33  ;;  %v1244_v46 = vmul.f32 %v2476_v25, %v2535_v43 }
  0x38   : > { %v775_v45 = vadd.f32 %v743_v19, %v675_v28  ;;  %v576_v47 = vadd.f32 %v544_v36, %v444_v35  ;;  %v744_v32 = vmul.f32 %v2505_v63, %v2417_v29  ;;  %1305 = vst.msk [vmem:[#allocation3] sm:$0xff] %vm263_vm1, %v1273_v39  ;;  %v844_v49 = vmul.f32 %v2509_v6, %v2420_v30 }
  0x39   : > { %v1274_v38 = vadd.f32 %v1242_v60, %v1174_v40  ;;  %v1075_v44 = vadd.f32 %v1043_v5, %v974_v41  ;;  %v944_v50 = vmul.f32 %v2513_v8, %v2423_v31  ;;  %v1045_v54 = vmul.f32 %v2431_v34, %v2546_v51 }
  0x3a   : > { %v875_v52 = vadd.f32 %v843_v20, %v775_v45  ;;  %v676_v53 = vadd.f32 %v644_v37, %v576_v47  ;;  %v445_v58 = vmul.f32 %v2493_v48, %v2404_v15  ;;  %v1145_v60 = vmul.f32 %v2456_v3, %v2550_v57  ;;  %v2580_v20 = vld [vmem:[#allocation2 + $0x6a] sm:$0xff] }
  0x3b   : > { %1306 = vst.msk [vmem:[#allocation3 + $0x8] sm:$0xff] %vm263_vm1, %v1274_v38  ;;  %v1175_v59 = vadd.f32 %v1143_v7, %v1075_v44  ;;  %v545_v62 = vmul.f32 %v1106_v55, %v2407_v16  ;;  %v645_v0 = vmul.f32 %v1206_v56, %v2410_v17  ;;  %v1245_v5 = vmul.f32 %v2476_v25, %v2557_v61  ;;  %v2602_v38 = vld [vmem:[#allocation2 + $0x79] sm:$0xff] }
  0x3c   : > { %v975_v1 = vadd.f32 %v943_v21, %v875_v52  ;;  %v776_v2 = vadd.f32 %v744_v32, %v676_v53  ;;  %v745_v48 = vmul.f32 %v2524_v22, %v2417_v29  ;;  %v845_v7 = vmul.f32 %v2528_v33, %v2420_v30  ;;  %v2604_v44 = vld [vmem:[#allocation2 + $0x7a] sm:$0xff] }
  0x3d   : > { %v1275_v9 = vadd.f32 %v1243_v14, %v1175_v59  ;;  %v577_v10 = vadd.f32 %v545_v62, %v445_v58  ;;  %v945_v11 = vmul.f32 %v2535_v43, %v2423_v31  ;;  %v1046_v12 = vmul.f32 %v2431_v34, %v2569_v4  ;;  %v2619_v62 = vld [vmem:[#allocation2 + $0x80] sm:$0xff] }
  0x3e   : > { %v1076_v55 = vadd.f32 %v1044_v27, %v975_v1  ;;  %v876_v56 = vadd.f32 %v844_v49, %v776_v2  ;;  %v446_v18 = vmul.f32 %v2505_v63, %v2404_v15  ;;  %v1146_v19 = vmul.f32 %v2456_v3, %v2573_v13 }
  0x3f   : > { %1307 = vst.msk [vmem:[#allocation3 + $0x10] sm:$0xff] %vm263_vm1, %v1275_v9  ;;  %v677_v14 = vadd.f32 %v645_v0, %v577_v10  ;;  %v546_v21 = vmul.f32 %v2509_v6, %v2407_v16  ;;  %v646_v23 = vmul.f32 %v2513_v8, %v2410_v17  ;;  %v1337_v24 = vld [vmem:[#allocation3] sm:$0xff]  ;;  %v1246_v63 = vmul.f32 %v2476_v25, %v2580_v20  ;;  %v2595_v8 = vld [vmem:[#allocation2 + $0x78] sm:$0xff] }
  0x40   : > { %v1176_v26 = vadd.f32 %v1144_v42, %v1076_v55  ;;  %v976_v27 = vadd.f32 %v944_v50, %v876_v56  ;;  %v746_v28 = vmul.f32 %v2546_v51, %v2417_v29  ;;  %2089 = vmatprep.mubr.msk.f32.mxu0 %vm263_vm1, %v1337_v24  ;;  %v846_v37 = vmul.f32 %v2550_v57, %v2420_v30  ;;  %v2643_v24 = vld [vmem:[#allocation2 + $0x90] sm:$0xff] }
  0x41   : > { %v777_v35 = vadd.f32 %v745_v48, %v677_v14  ;;  %v578_v36 = vadd.f32 %v546_v21, %v446_v18  ;;  %v946_v6 = vmul.f32 %v2557_v61, %v2423_v31  ;;  %v1047_v42 = vmul.f32 %v2431_v34, %v2595_v8 }
  0x42   : > { %v1338_v39 = vld [vmem:[#allocation3 + $0x8] sm:$0xff]  ;;  %v1276_v40 = vadd.f32 %v1244_v46, %v1176_v26  ;;  %v1077_v41 = vadd.f32 %v1045_v54, %v976_v27  ;;  %v447_v45 = vmul.f32 %v2524_v22, %v2404_v15  ;;  %v547_v49 = vmul.f32 %v2528_v33, %v2407_v16 }
  0x43   : > { %2090 = vmatmul.mubr.msk.f32.vlgmr.msra.gmra.mrb[0].mxu0 %vm263_vm1, %v1338_v39  ;;  %v877_v47 = vadd.f32 %v845_v7, %v777_v35  ;;  %v678_v32 = vadd.f32 %v646_v23, %v578_v36  ;;  %v647_v46 = vmul.f32 %v2535_v43, %v2410_v17  ;;  %v1147_v22 = vmul.f32 %v2456_v3, %v2602_v38  ;;  %v2628_v7 = vld [vmem:[#allocation2 + $0x81] sm:$0xff]  ;;  %v2655_v39 = vld [vmem:[#allocation2 + $0x92] sm:$0xff] }
  0x44   : > { %1308 = vst.msk [vmem:[#allocation3 + $0x18] sm:$0xff] %vm263_vm1, %v1276_v40  ;;  %v1177_v50 = vadd.f32 %v1145_v60, %v1077_v41  ;;  %v1247_v52 = vmul.f32 %v2476_v25, %v2604_v44  ;;  %v747_v53 = vmul.f32 %v2569_v4, %v2417_v29  ;;  %v579_v59 = vadd.f32 %v547_v49, %v447_v45  ;;  %v2669_v49 = vld [vmem:[#allocation2 + $0x98] sm:$0xff] }
  0x45   : > { %v977_v54 = vadd.f32 %v945_v11, %v877_v47  ;;  %v778_v58 = vadd.f32 %v746_v28, %v678_v32  ;;  %v847_v33 = vmul.f32 %v2573_v13, %v2420_v30  ;;  %v947_v60 = vmul.f32 %v2580_v20, %v2423_v31  ;;  %v2630_v11 = vld [vmem:[#allocation2 + $0x82] sm:$0xff] }
  0x46   : > { %v1339_v43 = vld [vmem:[#allocation3 + $0x10] sm:$0xff]  ;;  %v1277_v0 = vadd.f32 %v1245_v5, %v1177_v50  ;;  %v1048_v1 = vmul.f32 %v2431_v34, %v2619_v62  ;;  %v448_v2 = vmul.f32 %v2546_v51, %v2404_v15  ;;  %v679_v10 = vadd.f32 %v647_v46, %v579_v59 }
  0x47   : > { %2092 = vmatprep.mubr.msk.f32.mxu0 %vm263_vm1, %v1339_v43  ;;  %v1078_v48 = vadd.f32 %v1046_v12, %v977_v54  ;;  %v878_v9 = vadd.f32 %v846_v37, %v778_v58  ;;  %v548_v5 = vmul.f32 %v2550_v57, %v2407_v16  ;;  %v1148_v55 = vmul.f32 %v2456_v3, %v2628_v7  ;;  %v2677_v59 = vld [vmem:[#allocation2 + $0x99] sm:$0xff] }
  0x48   : > { %1309 = vst.msk [vmem:[#allocation3 + $0x20] sm:$0xff] %vm263_vm1, %v1277_v0  ;;  %v1248_v51 = vmul.f32 %v2476_v25, %v2630_v11  ;;  %v648_v56 = vmul.f32 %v2557_v61, %v2410_v17  ;;  %v748_v12 = vmul.f32 %v2595_v8, %v2417_v29  ;;  %v779_v21 = vadd.f32 %v747_v53, %v679_v10 }
  0x49   : > { %v1178_v18 = vadd.f32 %v1146_v19, %v1078_v48  ;;  %v978_v14 = vadd.f32 %v946_v6, %v878_v9  ;;  %v580_v23 = vadd.f32 %v548_v5, %v448_v2  ;;  %v848_v57 = vmul.f32 %v2602_v38, %v2420_v30  ;;  %v2653_v6 = vld [vmem:[#allocation2 + $0x91] sm:$0xff] }
  0x4a   : > { %v948_v26 = vmul.f32 %v2604_v44, %v2423_v31  ;;  %v1049_v27 = vmul.f32 %v2431_v34, %v2643_v24  ;;  %v449_v61 = vmul.f32 %v2569_v4, %v2404_v15  ;;  %v879_v36 = vadd.f32 %v847_v33, %v779_v21 }
  0x4b   : > { %v1340_v28 = vld [vmem:[#allocation3 + $0x18] sm:$0xff]  ;;  %v1278_v35 = vadd.f32 %v1246_v63, %v1178_v18  ;;  %v1079_v19 = vadd.f32 %v1047_v42, %v978_v14  ;;  %v680_v37 = vadd.f32 %v648_v56, %v580_v23  ;;  %v1149_v40 = vmul.f32 %v2456_v3, %v2653_v6 }
  0x4c   : > { %2093 = vmatmul.mubr.msk.f32.gmra.mrb[2].mxu0 %vm263_vm1, %v1340_v28  ;;  %v1249_v41 = vmul.f32 %v2476_v25, %v2655_v39  ;;  %v549_v4 = vmul.f32 %v2573_v13, %v2407_v16  ;;  %v649_v63 = vmul.f32 %v2580_v20, %v2410_v17  ;;  %v979_v45 = vadd.f32 %v947_v60, %v879_v36  ;;  %v2684_v60 = vld [vmem:[#allocation2 + $0x9a] sm:$0xff] }
  0x4d   : > { %1310 = vst.msk [vmem:[#allocation3 + $0x28] sm:$0xff] %vm263_vm1, %v1278_v35  ;;  %v1179_v42 = vadd.f32 %v1147_v22, %v1079_v19  ;;  %v780_v47 = vadd.f32 %v748_v12, %v680_v37  ;;  %v749_v32 = vmul.f32 %v2619_v62, %v2417_v29  ;;  %v849_v50 = vmul.f32 %v2628_v7, %v2420_v30  ;;  %v2699_v12 = vld [vmem:[#allocation2 + $0xa8] sm:$0xff] }
  0x4e   : > { %v581_v46 = vadd.f32 %v549_v4, %v449_v61  ;;  %v949_v13 = vmul.f32 %v2630_v11, %v2423_v31  ;;  %v1050_v20 = vmul.f32 %v2431_v34, %v2669_v49  ;;  %v1080_v22 = vadd.f32 %v1048_v1, %v979_v45  ;;  %v2707_v61 = vld [vmem:[#allocation2 + $0xaa] sm:$0xff] }
  0x4f   : > { %v1341_v53 = vld [vmem:[#allocation3 + $0x20] sm:$0xff]  ;;  %v1279_v54 = vadd.f32 %v1247_v52, %v1179_v42  ;;  %v880_v58 = vadd.f32 %v848_v57, %v780_v47  ;;  %v450_v33 = vmul.f32 %v2595_v8, %v2404_v15  ;;  %v1150_v0 = vmul.f32 %v2456_v3, %v2677_v59 }
  0x50   : > { %2095 = vmatprep.mubr.msk.f32.mxu0 %vm263_vm1, %v1341_v53  ;;  %v681_v43 = vadd.f32 %v649_v63, %v581_v46  ;;  %v550_v2 = vmul.f32 %v2602_v38, %v2407_v16  ;;  %v650_v52 = vmul.f32 %v2604_v44, %v2410_v17  ;;  %v1180_v1 = vadd.f32 %v1148_v55, %v1080_v22  ;;  %v2723_v4 = vld [vmem:[#allocation2 + $0xb0] sm:$0xff] }
  0x51   : > { %1311 = vst.msk [vmem:[#allocation3 + $0x30] sm:$0xff] %vm263_vm1, %v1279_v54  ;;  %v980_v48 = vadd.f32 %v948_v26, %v880_v58  ;;  %v1250_v8 = vmul.f32 %v2476_v25, %v2684_v60  ;;  %v750_v9 = vmul.f32 %v2643_v24, %v2417_v29  ;;  %v850_v56 = vmul.f32 %v2653_v6, %v2420_v30  ;;  %v2705_v26 = vld [vmem:[#allocation2 + $0xa9] sm:$0xff]  ;;  %v2733_v53 = vld [vmem:[#allocation2 + $0xb2] sm:$0xff] }
  0x52   : > { %v781_v10 = vadd.f32 %v749_v32, %v681_v43  ;;  %v582_v5 = vadd.f32 %v550_v2, %v450_v33  ;;  %v950_v38 = vmul.f32 %v2655_v39, %v2423_v31  ;;  %v1280_v44 = vadd.f32 %v1248_v51, %v1180_v1  ;;  %v2747_v2 = vld [vmem:[#allocation2 + $0xc0] sm:$0xff] }
  0x53   : > { %v1081_v18 = vadd.f32 %v1049_v27, %v980_v48  ;;  %v1051_v55 = vmul.f32 %v2431_v34, %v2699_v12  ;;  %v451_v14 = vmul.f32 %v2619_v62, %v2404_v15  ;;  %v551_v28 = vmul.f32 %v2628_v7, %v2407_v16 }
  0x54   : > { %v1342_v21 = vld [vmem:[#allocation3 + $0x28] sm:$0xff]  ;;  %v881_v23 = vadd.f32 %v849_v50, %v781_v10  ;;  %v682_v57 = vadd.f32 %v650_v52, %v582_v5  ;;  %v651_v51 = vmul.f32 %v2630_v11, %v2410_v17  ;;  %1312 = vst.msk [vmem:[#allocation3 + $0x38] sm:$0xff] %vm263_vm1, %v1280_v44  ;;  %v1151_v62 = vmul.f32 %v2456_v3, %v2705_v26  ;;  %v2759_v44 = vld [vmem:[#allocation2 + $0xc2] sm:$0xff] }
  0x55   : > { %2096 = vmatmul.mubr.msk.f32.gmra.mrb[4].mxu0 %vm263_vm1, %v1342_v21  ;;  %v1181_v27 = vadd.f32 %v1149_v40, %v1081_v18  ;;  %v1251_v35 = vmul.f32 %v2476_v25, %v2707_v61  ;;  %v751_v19 = vmul.f32 %v2669_v49, %v2417_v29  ;;  %v583_v7 = vadd.f32 %v551_v28, %v451_v14  ;;  %v2773_v28 = vld [vmem:[#allocation2 + $0xc8] sm:$0xff] }
  0x56   : > { %v981_v36 = vadd.f32 %v949_v13, %v881_v23  ;;  %v782_v37 = vadd.f32 %v750_v9, %v682_v57  ;;  %v851_v11 = vmul.f32 %v2677_v59, %v2420_v30  ;;  %v951_v40 = vmul.f32 %v2684_v60, %v2423_v31  ;;  %v2731_v13 = vld [vmem:[#allocation2 + $0xb1] sm:$0xff] }
  0x57   : > { %v1281_v63 = vadd.f32 %v1249_v41, %v1181_v27  ;;  %v1052_v42 = vmul.f32 %v2431_v34, %v2723_v4  ;;  %v452_v45 = vmul.f32 %v2643_v24, %v2404_v15  ;;  %v683_v50 = vadd.f32 %v651_v51, %v583_v7  ;;  %v2781_v7 = vld [vmem:[#allocation2 + $0xc9] sm:$0xff] }
  0x58   : > { %v1343_v47 = vld [vmem:[#allocation3 + $0x30] sm:$0xff]  ;;  %v1082_v32 = vadd.f32 %v1050_v20, %v981_v36  ;;  %v882_v46 = vadd.f32 %v850_v56, %v782_v37  ;;  %v552_v41 = vmul.f32 %v2653_v6, %v2407_v16  ;;  %v1152_v54 = vmul.f32 %v2456_v3, %v2731_v13 }
  0x59   : > { %2098 = vmatprep.mubr.msk.f32.mxu0 %vm263_vm1, %v1343_v47  ;;  %1313 = vst.msk [vmem:[#allocation3 + $0x40] sm:$0xff] %vm263_vm1, %v1281_v63  ;;  %v1252_v24 = vmul.f32 %v2476_v25, %v2733_v53  ;;  %v652_v20 = vmul.f32 %v2655_v39, %v2410_v17  ;;  %v752_v22 = vmul.f32 %v2699_v12, %v2417_v29 }
  0x5a   : > { %v1182_v58 = vadd.f32 %v1150_v0, %v1082_v32  ;;  %v982_v33 = vadd.f32 %v950_v38, %v882_v46  ;;  %v783_v43 = vadd.f32 %v751_v19, %v683_v50  ;;  %v584_v6 = vadd.f32 %v552_v41, %v452_v45  ;;  %v2757_v38 = vld [vmem:[#allocation2 + $0xc1] sm:$0xff]  ;;  %v2788_v45 = vld [vmem:[#allocation2 + $0xca] sm:$0xff] }
  0x5b   : > { %v852_v52 = vmul.f32 %v2705_v26, %v2420_v30  ;;  %v952_v1 = vmul.f32 %v2707_v61, %v2423_v31  ;;  %v1053_v48 = vmul.f32 %v2431_v34, %v2747_v2  ;;  %v453_v39 = vmul.f32 %v2669_v49, %v2404_v15  ;;  %v1344_v9 = vld [vmem:[#allocation3 + $0x38] sm:$0xff] }
  0x5c   : > { %v1282_v10 = vadd.f32 %v1250_v8, %v1182_v58  ;;  %v1083_v0 = vadd.f32 %v1051_v55, %v982_v33  ;;  %v883_v5 = vadd.f32 %v851_v11, %v783_v43  ;;  %v684_v56 = vadd.f32 %v652_v20, %v584_v6  ;;  %2099 = vmatmul.mubr.msk.f32.gmra.mrb[6].mxu0 %vm263_vm1, %v1344_v9 }
  0x5d   : > { %v1153_v18 = vmul.f32 %v2456_v3, %v2757_v38  ;;  %v1253_v14 = vmul.f32 %v2476_v25, %v2759_v44  ;;  %v553_v49 = vmul.f32 %v2677_v59, %v2407_v16  ;;  %v653_v8 = vmul.f32 %v2684_v60, %v2410_v17 }
  0x5e   : > { %1314 = vst.msk [vmem:[#allocation3 + $0x48] sm:$0xff] %vm263_vm1, %v1282_v10  ;;  %v1183_v55 = vadd.f32 %v1151_v62, %v1083_v0  ;;  %v983_v21 = vadd.f32 %v951_v40, %v883_v5  ;;  %v784_v23 = vadd.f32 %v752_v22, %v684_v56  ;;  %v753_v57 = vmul.f32 %v2723_v4, %v2417_v29  ;;  %v2803_v22 = vld [vmem:[#allocation2 + $0xd8] sm:$0xff] }
  0x5f   : > { %v585_v51 = vadd.f32 %v553_v49, %v453_v39  ;;  %v853_v27 = vmul.f32 %v2731_v13, %v2420_v30  ;;  %v953_v59 = vmul.f32 %v2733_v53, %v2423_v31  ;;  %v1054_v60 = vmul.f32 %v2431_v34, %v2773_v28  ;;  %v2811_v39 = vld [vmem:[#allocation2 + $0xda] sm:$0xff] }
  0x60   : > { %v1345_v19 = vld [vmem:[#allocation3 + $0x40] sm:$0xff]  ;;  %v1283_v36 = vadd.f32 %v1251_v35, %v1183_v55  ;;  %v1084_v62 = vadd.f32 %v1052_v42, %v983_v21  ;;  %v884_v37 = vadd.f32 %v852_v52, %v784_v23  ;;  %v454_v11 = vmul.f32 %v2699_v12, %v2404_v15  ;;  %v2827_v49 = vld [vmem:[#allocation2 + $0xe0] sm:$0xff] }
  0x61   : > { %2101 = vmatprep.mubr.msk.f32.mxu0 %vm263_vm1, %v1345_v19  ;;  %v685_v63 = vadd.f32 %v653_v8, %v585_v51  ;;  %v1154_v40 = vmul.f32 %v2456_v3, %v2781_v7  ;;  %v554_v47 = vmul.f32 %v2705_v26, %v2407_v16  ;;  %v654_v35 = vmul.f32 %v2707_v61, %v2410_v17  ;;  %v2837_v19 = vld [vmem:[#allocation2 + $0xe2] sm:$0xff] }
  0x62   : > { %1315 = vst.msk [vmem:[#allocation3 + $0x50] sm:$0xff] %vm263_vm1, %v1283_v36  ;;  %v1184_v42 = vadd.f32 %v1152_v54, %v1084_v62  ;;  %v984_v32 = vadd.f32 %v952_v1, %v884_v37  ;;  %v1254_v12 = vmul.f32 %v2476_v25, %v2788_v45  ;;  %v754_v46 = vmul.f32 %v2747_v2, %v2417_v29  ;;  %v2809_v1 = vld [vmem:[#allocation2 + $0xd9] sm:$0xff] }
  0x63   : > { %v785_v50 = vadd.f32 %v753_v57, %v685_v63  ;;  %v586_v41 = vadd.f32 %v554_v47, %v454_v11  ;;  %v854_v20 = vmul.f32 %v2757_v38, %v2420_v30  ;;  %v954_v26 = vmul.f32 %v2759_v44, %v2423_v31  ;;  %v2851_v47 = vld [vmem:[#allocation2 + $0xf0] sm:$0xff] }
  0x64   : > { %v1284_v61 = vadd.f32 %v1252_v24, %v1184_v42  ;;  %v1085_v58 = vadd.f32 %v1053_v48, %v984_v32  ;;  %v1055_v54 = vmul.f32 %v2431_v34, %v2803_v22  ;;  %v455_v33 = vmul.f32 %v2723_v4, %v2404_v15 }
  0x65   : > { %v1346_v43 = vld [vmem:[#allocation3 + $0x48] sm:$0xff]  ;;  %v885_v6 = vadd.f32 %v853_v27, %v785_v50  ;;  %v686_v52 = vadd.f32 %v654_v35, %v586_v41  ;;  %v555_v9 = vmul.f32 %v2731_v13, %v2407_v16  ;;  %v655_v24 = vmul.f32 %v2733_v53, %v2410_v17 }
  0x66   : > { %2102 = vmatmul.mubr.msk.f32.gmra.mrb[8].mxu0 %vm263_vm1, %v1346_v43  ;;  %1316 = vst.msk [vmem:[#allocation3 + $0x58] sm:$0xff] %vm263_vm1, %v1284_v61  ;;  %v1185_v48 = vadd.f32 %v1153_v18, %v1085_v58  ;;  %v1155_v4 = vmul.f32 %v2456_v3, %v2809_v1  ;;  %v1255_v10 = vmul.f32 %v2476_v25, %v2811_v39  ;;  %v2863_v61 = vld [vmem:[#allocation2 + $0xf2] sm:$0xff] }
  0x67   : > { %v755_v0 = vmul.f32 %v2773_v28, %v2417_v29  ;;  %v985_v5 = vadd.f32 %v953_v59, %v885_v6  ;;  %v786_v56 = vadd.f32 %v754_v46, %v686_v52  ;;  %v587_v13 = vadd.f32 %v555_v9, %v455_v33  ;;  %v2835_v59 = vld [vmem:[#allocation2 + $0xe1] sm:$0xff]  ;;  %v2877_v9 = vld [vmem:[#allocation2 + $0xf8] sm:$0xff] }
  0x68   : > { %v855_v53 = vmul.f32 %v2781_v7, %v2420_v30  ;;  %v1285_v8 = vadd.f32 %v1253_v14, %v1185_v48  ;;  %v955_v18 = vmul.f32 %v2788_v45, %v2423_v31  ;;  %v1056_v55 = vmul.f32 %v2431_v34, %v2827_v49 }
  0x69   : > { %v456_v21 = vmul.f32 %v2747_v2, %v2404_v15  ;;  %v1347_v23 = vld [vmem:[#allocation3 + $0x50] sm:$0xff]  ;;  %v1086_v57 = vadd.f32 %v1054_v60, %v985_v5  ;;  %v886_v51 = vadd.f32 %v854_v20, %v786_v56  ;;  %v687_v27 = vadd.f32 %v655_v24, %v587_v13 }
  0x6a   : > { %v556_v14 = vmul.f32 %v2757_v38, %v2407_v16  ;;  %2104 = vmatprep.mubr.msk.f32.mxu0 %vm263_vm1, %v1347_v23  ;;  %1317 = vst.msk [vmem:[#allocation3 + $0x60] sm:$0xff] %vm263_vm1, %v1285_v8  ;;  %v1156_v36 = vmul.f32 %v2456_v3, %v2835_v59  ;;  %v1256_v2 = vmul.f32 %v2476_v25, %v2837_v19  ;;  %v2885_v13 = vld [vmem:[#allocation2 + $0xf9] sm:$0xff] }
  0x6b   : > { %v656_v60 = vmul.f32 %v2759_v44, %v2410_v17  ;;  %v756_v62 = vmul.f32 %v2803_v22, %v2417_v29  ;;  %v1186_v37 = vadd.f32 %v1154_v40, %v1086_v57  ;;  %v986_v11 = vadd.f32 %v954_v26, %v886_v51  ;;  %v2861_v26 = vld [vmem:[#allocation2 + $0xf1] sm:$0xff] }
  0x6c   : > { %v787_v63 = vadd.f32 %v755_v0, %v687_v27  ;;  %v588_v38 = vadd.f32 %v556_v14, %v456_v21  ;;  %v856_v35 = vmul.f32 %v2809_v1, %v2420_v30  ;;  %v956_v42 = vmul.f32 %v2811_v39, %v2423_v31  ;;  %v2892_v21 = vld [vmem:[#allocation2 + $0xfa] sm:$0xff] }
  0x6d   : > { %v1057_v32 = vmul.f32 %v2431_v34, %v2851_v47  ;;  %v457_v44 = vmul.f32 %v2773_v28, %v2404_v15  ;;  %v1348_v46 = vld [vmem:[#allocation3 + $0x58] sm:$0xff]  ;;  %v1286_v50 = vadd.f32 %v1254_v12, %v1186_v37  ;;  %v1087_v40 = vadd.f32 %v1055_v54, %v986_v11 }
  0x6e   : > { %v887_v41 = vadd.f32 %v855_v53, %v787_v63  ;;  %v688_v20 = vadd.f32 %v656_v60, %v588_v38  ;;  %2105 = vmatmul.mubr.msk.f32.gmra.mrb[10].mxu0 %vm263_vm1, %v1348_v46  ;;  %v1157_v58 = vmul.f32 %v2456_v3, %v2861_v26  ;;  %v1257_v33 = vmul.f32 %v2476_v25, %v2863_v61 }
  0x6f   : > { %v557_v28 = vmul.f32 %v2781_v7, %v2407_v16  ;;  %v657_v12 = vmul.f32 %v2788_v45, %v2410_v17  ;;  %1318 = vst.msk [vmem:[#allocation3 + $0x68] sm:$0xff] %vm263_vm1, %v1286_v50  ;;  %v1187_v54 = vadd.f32 %v1155_v4, %v1087_v40  ;;  %v757_v52 = vmul.f32 %v2827_v49, %v2417_v29 }
  0x70   : > { %v987_v43 = vadd.f32 %v955_v18, %v887_v41  ;;  %v788_v6 = vadd.f32 %v756_v62, %v688_v20  ;;  %v857_v48 = vmul.f32 %v2835_v59, %v2420_v30  ;;  %v957_v7 = vmul.f32 %v2837_v19, %v2423_v31  ;;  %v2907_v62 = vld [vmem:[#allocation2 + $0x108] sm:$0xff] }
  0x71   : > { %v589_v24 = vadd.f32 %v557_v28, %v457_v44  ;;  %v1058_v45 = vmul.f32 %v2431_v34, %v2877_v9  ;;  %v1349_v0 = vld [vmem:[#allocation3 + $0x60] sm:$0xff]  ;;  %v1287_v5 = vadd.f32 %v1255_v10, %v1187_v54  ;;  %v458_v53 = vmul.f32 %v2803_v22, %v2404_v15 }
  0x72   : > { %v1088_v4 = vadd.f32 %v1056_v55, %v987_v43  ;;  %v888_v56 = vadd.f32 %v856_v35, %v788_v6  ;;  %2107 = vmatprep.mubr.msk.f32.mxu0 %vm263_vm1, %v1349_v0  ;;  %v1158_v18 = vmul.f32 %v2456_v3, %v2885_v13  ;;  %v558_v23 = vmul.f32 %v2809_v1, %v2407_v16  ;;  %v2915_v44 = vld [vmem:[#allocation2 + $0x10a] sm:$0xff]  ;;  %v2941_v0 = vld [vmem:[#allocation2 + $0x112] sm:$0xff] }
  0x73   : > { %v689_v8 = vadd.f32 %v657_v12, %v589_v24  ;;  %v658_v10 = vmul.f32 %v2811_v39, %v2410_v17  ;;  %1319 = vst.msk [vmem:[#allocation3 + $0x70] sm:$0xff] %vm263_vm1, %v1287_v5  ;;  %v1258_v22 = vmul.f32 %v2476_v25, %v2892_v21  ;;  %v758_v51 = vmul.f32 %v2851_v47, %v2417_v29  ;;  %v2931_v28 = vld [vmem:[#allocation2 + $0x110] sm:$0xff] }
  0x74   : > { %v1188_v55 = vadd.f32 %v1156_v36, %v1088_v4  ;;  %v988_v57 = vadd.f32 %v956_v42, %v888_v56  ;;  %v590_v14 = vadd.f32 %v558_v23, %v458_v53  ;;  %v858_v60 = vmul.f32 %v2861_v26, %v2420_v30  ;;  %v2913_v42 = vld [vmem:[#allocation2 + $0x109] sm:$0xff]  ;;  %v2955_v23 = vld [vmem:[#allocation2 + $0x120] sm:$0xff] }
  0x75   : > { %v789_v27 = vadd.f32 %v757_v52, %v689_v8  ;;  %v958_v1 = vmul.f32 %v2863_v61, %v2423_v31  ;;  %v1059_v36 = vmul.f32 %v2431_v34, %v2907_v62  ;;  %v459_v11 = vmul.f32 %v2827_v49, %v2404_v15 }
  0x76   : > { %v1288_v39 = vadd.f32 %v1256_v2, %v1188_v55  ;;  %v1089_v37 = vadd.f32 %v1057_v32, %v988_v57  ;;  %v1350_v63 = vld [vmem:[#allocation3 + $0x68] sm:$0xff]  ;;  %v690_v35 = vadd.f32 %v658_v10, %v590_v14  ;;  %v559_v46 = vmul.f32 %v2835_v59, %v2407_v16 }
  0x77   : > { %v889_v38 = vadd.f32 %v857_v48, %v789_v27  ;;  %v659_v2 = vmul.f32 %v2837_v19, %v2410_v17  ;;  %2108 = vmatmul.mubr.msk.f32.gmra.mrb[12].mxu0 %vm263_vm1, %v1350_v63  ;;  %v1159_v49 = vmul.f32 %v2456_v3, %v2913_v42  ;;  %v1259_v50 = vmul.f32 %v2476_v25, %v2915_v44 }
  0x78   : > { %1320 = vst.msk [vmem:[#allocation3 + $0x78] sm:$0xff] %vm263_vm1, %v1288_v39  ;;  %v1189_v32 = vadd.f32 %v1157_v58, %v1089_v37  ;;  %v759_v40 = vmul.f32 %v2877_v9, %v2417_v29  ;;  %v790_v20 = vadd.f32 %v758_v51, %v690_v35  ;;  %v591_v59 = vadd.f32 %v559_v46, %v459_v11  ;;  %v2967_v39 = vld [vmem:[#allocation2 + $0x122] sm:$0xff] }
  0x79   : > { %v989_v41 = vadd.f32 %v957_v7, %v889_v38  ;;  %v859_v19 = vmul.f32 %v2885_v13, %v2420_v30  ;;  %v959_v58 = vmul.f32 %v2892_v21, %v2423_v31  ;;  %v1060_v54 = vmul.f32 %v2431_v34, %v2931_v28  ;;  %v2939_v7 = vld [vmem:[#allocation2 + $0x111] sm:$0xff] }
  0x7a   : > { %v1289_v12 = vadd.f32 %v1257_v33, %v1189_v32  ;;  %v460_v43 = vmul.f32 %v2851_v47, %v2404_v15  ;;  %v1351_v6 = vld [vmem:[#allocation3 + $0x70] sm:$0xff]  ;;  %v890_v24 = vadd.f32 %v858_v60, %v790_v20  ;;  %v691_v48 = vadd.f32 %v659_v2, %v591_v59  ;;  %v2982_v2 = vld [vmem:[#allocation2 + $0x128] sm:$0xff] }
  0x7b   : > { %v1090_v52 = vadd.f32 %v1058_v45, %v989_v41  ;;  %v560_v33 = vmul.f32 %v2861_v26, %v2407_v16  ;;  %2110 = vmatprep.mubr.msk.f32.mxu0 %vm263_vm1, %v1351_v6  ;;  %v1160_v5 = vmul.f32 %v2456_v3, %v2939_v7  ;;  %v1260_v47 = vmul.f32 %v2476_v25, %v2941_v0  ;;  %v333_v32 = vld [vmem:[%s2395_s15 + $0xc8] sm:$0xff] }
  0x7c   : > { %1321 = vst.msk [vmem:[#allocation3 + $0x80] sm:$0xff] %vm263_vm1, %v1289_v12  ;;  %v660_v45 = vmul.f32 %v2863_v61, %v2410_v17  ;;  %v760_v4 = vmul.f32 %v2907_v62, %v2417_v29  ;;  %v990_v53 = vadd.f32 %v958_v1, %v890_v24  ;;  %v791_v8 = vadd.f32 %v759_v40, %v691_v48  ;;  %v2965_v1 = vld [vmem:[#allocation2 + $0x121] sm:$0xff] }
  0x7d   : > { %v1190_v56 = vadd.f32 %v1158_v18, %v1090_v52  ;;  %v592_v26 = vadd.f32 %v560_v33, %v460_v43  ;;  %v860_v10 = vmul.f32 %v2913_v42, %v2420_v30  ;;  %v960_v55 = vmul.f32 %v2915_v44, %v2423_v31 }
  0x7e   : > { %v1061_v57 = vmul.f32 %v2431_v34, %v2955_v23  ;;  %v461_v61 = vmul.f32 %v2877_v9, %v2404_v15  ;;  %v1091_v27 = vadd.f32 %v1059_v36, %v990_v53  ;;  %v891_v14 = vadd.f32 %v859_v19, %v791_v8  ;;  %v332_v36 = vld [vmem:[%s2395_s15 + $0xc0] sm:$0xff]  ;;  %v334_v8 = vld [vmem:[%s2395_s15 + $0xd0] sm:$0xff] }
  0x7f   : > { %v1352_v51 = vld [vmem:[#allocation3 + $0x78] sm:$0xff]  ;;  %v1290_v18 = vadd.f32 %v1258_v22, %v1190_v56  ;;  %v692_v60 = vadd.f32 %v660_v45, %v592_v26  ;;  %v1161_v37 = vmul.f32 %v2456_v3, %v2965_v1  ;;  %v1261_v11 = vmul.f32 %v2476_v25, %v2967_v39 }
  0x80   : > { %2111 = vmatmul.mubr.msk.f32.gmra.mrb[14].mxu0 %vm263_vm1, %v1352_v51  ;;  %v561_v9 = vmul.f32 %v2885_v13, %v2407_v16  ;;  %v661_v22 = vmul.f32 %v2892_v21, %v2410_v17  ;;  %v1191_v63 = vadd.f32 %v1159_v49, %v1091_v27  ;;  %v991_v38 = vadd.f32 %v959_v58, %v891_v14  ;;  %v2992_v58 = vld [vmem:[#allocation2 + $0x129] sm:$0xff] }
  0x81   : > { %1322 = vst.msk [vmem:[#allocation3 + $0x88] sm:$0xff] %vm263_vm1, %v1290_v18  ;;  %v792_v35 = vadd.f32 %v760_v4, %v692_v60  ;;  %v761_v46 = vmul.f32 %v2931_v28, %v2417_v29  ;;  %v861_v25 = vmul.f32 %v2939_v7, %v2420_v30  ;;  %v961_v13 = vmul.f32 %v2941_v0, %v2423_v31 }
  0x82   : > { %v593_v40 = vadd.f32 %v561_v9, %v461_v61  ;;  %v1062_v21 = vmul.f32 %v2431_v34, %v2982_v2  ;;  %v1291_v49 = vadd.f32 %v1259_v50, %v1191_v63  ;;  %v1092_v20 = vadd.f32 %v1060_v54, %v991_v38 }
  0x83   : > { %v1353_v41 = vld [vmem:[#allocation3 + $0x80] sm:$0xff]  ;;  %v892_v59 = vadd.f32 %v860_v10, %v792_v35  ;;  %v364_v19 = vmax.f32 %v332_v36, 0.0  ;;  %v365_v43 = vmax.f32 %v333_v32, 0.0  ;;  %v462_v6 = vmul.f32 %v2907_v62, %v2404_v15  ;;  %v3032_v35 = vld [vmem:[%s3363_s3 + $0x8] ss:$0 sm:$0xff] }
  0x84   : > { %2113 = vmatprep.mubr.msk.f32.mxu1 %vm263_vm1, %v1353_v41  ;;  %v693_v12 = vadd.f32 %v661_v22, %v593_v40  ;;  %v562_v52 = vmul.f32 %v2913_v42, %v2407_v16  ;;  %1323 = vst.msk [vmem:[#allocation3 + $0x90] sm:$0xff] %vm263_vm1, %v1291_v49  ;;  %v1192_v50 = vadd.f32 %v1160_v5, %v1092_v20  ;;  %v366_v14 = vmax.f32 %v334_v8, 0.0  ;;  %v1226_v22 = vld [vmem:[#allocation2 + $0x12a] sm:$0xff] }
  0x85   : > { %v992_v54 = vadd.f32 %v960_v55, %v892_v59  ;;  %v1162_v24 = vmul.f32 %v2456_v3, %v2992_v58  ;;  %396 = vst.msk [vmem:[#allocation2 + $0x139] sm:$0xff] %vm263_vm1, %v364_v19  ;;  %v662_v48 = vmul.f32 %v2915_v44, %v2410_v17  ;;  %397 = vst.msk [vmem:[#allocation2 + $0x141] sm:$0xff] %vm263_vm1, %v365_v43  ;;  %v335_v44 = vld [vmem:[%s2395_s15 + $0xd8] sm:$0xff] }
  0x86   : > { %v793_v33 = vadd.f32 %v761_v46, %v693_v12  ;;  %v594_v62 = vadd.f32 %v562_v52, %v462_v6  ;;  %v762_v42 = vmul.f32 %v2955_v23, %v2417_v29  ;;  %v862_v45 = vmul.f32 %v2965_v1, %v2420_v30  ;;  %398 = vst.msk [vmem:[#allocation2 + $0x151] sm:$0xff] %vm263_vm1, %v366_v14 }
  0x87   : > { %v1292_v5 = vadd.f32 %v1260_v47, %v1192_v50  ;;  %v1093_v4 = vadd.f32 %v1061_v57, %v992_v54  ;;  %v463_v56 = vmul.f32 %v2931_v28, %v2404_v15  ;;  %v563_v53 = vmul.f32 %v2939_v7, %v2407_v16 }
  0x88   : > { %v1354_v26 = vld [vmem:[#allocation3 + $0x88] sm:$0xff]  ;;  %v893_v10 = vadd.f32 %v861_v25, %v793_v33  ;;  %v694_v55 = vadd.f32 %v662_v48, %v594_v62  ;;  %v962_v61 = vmul.f32 %v2967_v39, %v2423_v31  ;;  %v663_v51 = vmul.f32 %v2941_v0, %v2410_v17 }
  0x89   : > { %2114 = vmatmul.mubr.msk.f32.vlgmr.msra.gmra.mrb[0].mxu1 %vm263_vm1, %v1354_v26  ;;  %1324 = vst.msk [vmem:[#allocation3 + $0x98] sm:$0xff] %vm263_vm1, %v1292_v5  ;;  %v1193_v47 = vadd.f32 %v1161_v37, %v1093_v4  ;;  %v595_v28 = vadd.f32 %v563_v53, %v463_v56  ;;  %v763_v7 = vmul.f32 %v2982_v2, %v2417_v29  ;;  %v367_v60 = vmax.f32 %v335_v44, 0.0 }
  0x8a   : > { %v863_v57 = vmul.f32 %v2992_v58, %v2420_v30  ;;  %v993_v18 = vadd.f32 %v961_v13, %v893_v10  ;;  %v794_v27 = vadd.f32 %v762_v42, %v694_v55  ;;  %v464_v0 = vmul.f32 %v2955_v23, %v2404_v15  ;;  %v336_v42 = vld [vmem:[%s2395_s15 + $0xe0] sm:$0xff] }
  0x8b   : > { %v1293_v9 = vadd.f32 %v1261_v11, %v1193_v47  ;;  %v695_v36 = vadd.f32 %v663_v51, %v595_v28  ;;  %v564_v37 = vmul.f32 %v2965_v1, %v2407_v16  ;;  %v1355_v63 = vld [vmem:[#allocation3 + $0x90] sm:$0xff]  ;;  %v1262_v46 = vmul.f32 %v3032_v35, %v1226_v22  ;;  %399 = vst.msk [vmem:[#allocation2 + $0x159] sm:$0xff] %vm263_vm1, %v367_v60  ;;  %v337_v47 = vld [vmem:[%s2395_s15 + $0xe8] sm:$0xff] }
  0x8c   : > { %v1094_v38 = vadd.f32 %v1062_v21, %v993_v18  ;;  %v894_v32 = vadd.f32 %v862_v45, %v794_v27  ;;  %v3035_v40 = vld [vmem:[#allocation2 + $0x138] sm:$0xff]  ;;  %v664_v23 = vmul.f32 %v2967_v39, %v2410_v17  ;;  %2116 = vmatprep.mubr.msk.f32.mxu1 %vm263_vm1, %v1355_v63  ;;  %v963_v13 = vmul.f32 %v1226_v22, %v2423_v31  ;;  %v3047_v19 = vld [vmem:[#allocation2 + $0x140] sm:$0xff] }
  0x8d   : > { %1325 = vst.msk [vmem:[#allocation3 + $0xa0] sm:$0xff] %vm263_vm1, %v1293_v9  ;;  %v1063_v1 = vmul.f32 %v2431_v34, %v3035_v40  ;;  %v1127_v11 = vld [vmem:[#allocation2 + $0x139] sm:$0xff]  ;;  %v795_v25 = vadd.f32 %v763_v7, %v695_v36  ;;  %v596_v21 = vadd.f32 %v564_v37, %v464_v0  ;;  %v465_v39 = vmul.f32 %v2982_v2, %v2404_v15  ;;  %v1128_v48 = vld [vmem:[#allocation2 + $0x141] sm:$0xff]  ;;  %v3066_v55 = vld [vmem:[#allocation2 + $0x150] sm:$0xff] }
  0x8e   : > { %v1194_v41 = vadd.f32 %v1162_v24, %v1094_v38  ;;  %v994_v49 = vadd.f32 %v962_v61, %v894_v32  ;;  %v1163_v20 = vmul.f32 %v2456_v3, %v1127_v11  ;;  %v1227_v59 = vld [vmem:[#allocation2 + $0x13a] sm:$0xff]  ;;  %v1064_v6 = vmul.f32 %v2431_v34, %v3047_v19  ;;  %v1228_v5 = vld [vmem:[#allocation2 + $0x142] sm:$0xff]  ;;  %v1129_v14 = vld [vmem:[#allocation2 + $0x151] sm:$0xff] }
  0x8f   : > { %v1263_v12 = vmul.f32 %v3032_v35, %v1227_v59  ;;  %v895_v43 = vadd.f32 %v863_v57, %v795_v25  ;;  %v696_v52 = vadd.f32 %v664_v23, %v596_v21  ;;  %v764_v33 = vmul.f32 %v3035_v40, %v2417_v29 }
  0x90   : > { %v1356_v50 = vld [vmem:[#allocation3 + $0x98] sm:$0xff]  ;;  %v1294_v54 = vadd.f32 %v1262_v46, %v1194_v41  ;;  %v1095_v24 = vadd.f32 %v1063_v1, %v994_v49  ;;  %v864_v62 = vmul.f32 %v1127_v11, %v2420_v30  ;;  %v1164_v45 = vmul.f32 %v2456_v3, %v1128_v48 }
  0x91   : > { %2117 = vmatmul.mubr.msk.f32.gmra.mrb[2].mxu1 %vm263_vm1, %v1356_v50  ;;  %v995_v2 = vadd.f32 %v963_v13, %v895_v43  ;;  %v565_v4 = vmul.f32 %v2992_v58, %v2407_v16  ;;  %v665_v56 = vmul.f32 %v1226_v22, %v2410_v17  ;;  %v1264_v8 = vmul.f32 %v3032_v35, %v1228_v5  ;;  %v339_v50 = vld [vmem:[%s2395_s15 + $0xf8] sm:$0xff] }
  0x92   : > { %1326 = vst.msk [vmem:[#allocation3 + $0xa8] sm:$0xff] %vm263_vm1, %v1294_v54  ;;  %v1195_v53 = vadd.f32 %v1163_v20, %v1095_v24  ;;  %v796_v44 = vadd.f32 %v764_v33, %v696_v52  ;;  %v964_v26 = vmul.f32 %v1227_v59, %v2423_v31  ;;  %v765_v51 = vmul.f32 %v3047_v19, %v2417_v29  ;;  %v1229_v60 = vld [vmem:[#allocation2 + $0x152] sm:$0xff] }
  0x93   : > { %v1096_v10 = vadd.f32 %v1064_v6, %v995_v2  ;;  %v597_v61 = vadd.f32 %v565_v4, %v465_v39  ;;  %v368_v28 = vmax.f32 %v336_v42, 0.0  ;;  %v1065_v18 = vmul.f32 %v2431_v34, %v3066_v55  ;;  %v3080_v23 = vld [vmem:[#allocation2 + $0x158] sm:$0xff]  ;;  %v338_v39 = vld [vmem:[%s2395_s15 + $0xf0] sm:$0xff]  ;;  %s2245_s15 = smov [#allocation4]  }
  0x94   : > { %v1357_v58 = vld [vmem:[#allocation3 + $0xa0] sm:$0xff]  ;;  %v1295_v7 = vadd.f32 %v1263_v12, %v1195_v53  ;;  %v896_v57 = vadd.f32 %v864_v62, %v796_v44  ;;  %v865_v22 = vmul.f32 %v1128_v48, %v2420_v30  ;;  %v965_v36 = vmul.f32 %v1228_v5, %v2423_v31  ;;  %v3082_v1 = vld [vmem:[#allocation2 + $0x159] sm:$0xff]  ;;  %s2184_s16 = sshll.u32 %s2245_s15, 4  ;;  %s2185_s16 = int_to_ptr.vmem [resolvable:$false] %s2184_s16 }
  0x95   : > { %2119 = vmatprep.mubr.msk.f32.mxu1 %vm263_vm1, %v1357_v58  ;;  %v1196_v27 = vadd.f32 %v1164_v45, %v1096_v10  ;;  %v697_v9 = vadd.f32 %v665_v56, %v597_v61  ;;  %400 = vst.msk [vmem:[#allocation2 + $0x169] sm:$0xff] %vm263_vm1, %v368_v28  ;;  %v1165_v37 = vmul.f32 %v2456_v3, %v1129_v14  ;;  %v369_v38 = vmax.f32 %v337_v47, 0.0  ;;  %v1230_v6 = vld [vmem:[#allocation2 + $0x15a] sm:$0xff]  ;;  %s2186_s17 = scalar_lea.vmem %s2185_s16, 64  ;;  %p2187_p0 = scmp.lt.s32.totalorder %s3319_s10, %s2185_s16 }
  0x96   : > { %1327 = vst.msk [vmem:[#allocation3 + $0xb0] sm:$0xff] %vm263_vm1, %v1295_v7  ;;  %v996_v0 = vadd.f32 %v964_v26, %v896_v57  ;;  %v1265_v63 = vmul.f32 %v3032_v35, %v1229_v60  ;;  %v466_v25 = vmul.f32 %v3035_v40, %v2404_v15  ;;  %v566_v13 = vmul.f32 %v1127_v11, %v2407_v16  ;;  %p2188_p1 = scmp.lt.s32.totalorder %s2186_s17, %s2180_s14 }
  0x97   : > { %v1296_v46 = vadd.f32 %v1264_v8, %v1196_v27  ;;  %v797_v32 = vadd.f32 %v765_v51, %v697_v9  ;;  %v1066_v41 = vmul.f32 %v2431_v34, %v3080_v23  ;;  %v1166_v49 = vmul.f32 %v2456_v3, %v3082_v1  ;;  %401 = vst.msk [vmem:[#allocation2 + $0x171] sm:$0xff] %vm263_vm1, %v369_v38 }
  0x98   : > { %v1097_v21 = vadd.f32 %v1065_v18, %v996_v0  ;;  %v666_v20 = vmul.f32 %v1227_v59, %v2410_v17  ;;  %v598_v40 = vadd.f32 %v566_v13, %v466_v25  ;;  %v766_v11 = vmul.f32 %v3066_v55, %v2417_v29  ;;  %p2189_p2 = por %p2188_p1, %p2187_p0 }
  0x99   : > { %v1358_v12 = vld [vmem:[#allocation3 + $0xa8] sm:$0xff]  ;;  %1328 = vst.msk [vmem:[#allocation3 + $0xb8] sm:$0xff] %vm263_vm1, %v1296_v46  ;;  %v897_v43 = vadd.f32 %v865_v22, %v797_v32  ;;  %v467_v52 = vmul.f32 %v3047_v19, %v2404_v15  ;;  %v1266_v24 = vmul.f32 %v3032_v35, %v1230_v6  ;;  %v567_v59 = vmul.f32 %v1128_v48, %v2407_v16 }
  0x9a   : > { %2120 = vmatmul.mubr.msk.f32.gmra.mrb[4].mxu1 %vm263_vm1, %v1358_v12  ;;  %v1197_v54 = vadd.f32 %v1165_v37, %v1097_v21  ;;  %v667_v33 = vmul.f32 %v1228_v5, %v2410_v17  ;;  %v698_v42 = vadd.f32 %v666_v20, %v598_v40  ;;  %v866_v2 = vmul.f32 %v1129_v14, %v2420_v30  ;;  %p2190_p3 = pnand %p2189_p2, %p2183_p13 }
  0x9b   : > { %v997_v62 = vadd.f32 %v965_v36, %v897_v43  ;;  %v767_v45 = vmul.f32 %v3080_v23, %v2417_v29  ;;  %v599_v56 = vadd.f32 %v567_v59, %v467_v52  ;;  %v370_v19 = vmax.f32 %v338_v39, 0.0 }
  0x9c   : > { %v1297_v4 = vadd.f32 %v1265_v63, %v1197_v54  ;;  %v371_v53 = vmax.f32 %v339_v50, 0.0  ;;  %v798_v26 = vadd.f32 %v766_v11, %v698_v42  ;;  %v966_v10 = vmul.f32 %v1229_v60, %v2423_v31  ;;  %v1031_v61 = vld [vmem:[#allocation2 + $0x168] sm:$0xff] }
  0x9d   : > { %v1359_v8 = vld [vmem:[#allocation3 + $0xb0] sm:$0xff]  ;;  %v1098_v44 = vadd.f32 %v1066_v41, %v997_v62  ;;  %v867_v48 = vmul.f32 %v3082_v1, %v2420_v30  ;;  %v699_v5 = vadd.f32 %v667_v33, %v599_v56  ;;  %v967_v51 = vmul.f32 %v1230_v6, %v2423_v31  ;;  %402 = vst.msk [vmem:[#allocation2 + $0x181] sm:$0xff] %vm263_vm1, %v370_v19  ;;  %v1131_v18 = vld [vmem:[#allocation2 + $0x169] sm:$0xff] }
  0x9e   : > { %2122 = vmatprep.mubr.msk.f32.mxu1 %vm263_vm1, %v1359_v8  ;;  %1329 = vst.msk [vmem:[#allocation3 + $0xc0] sm:$0xff] %vm263_vm1, %v1297_v4  ;;  %403 = vst.msk [vmem:[#allocation2 + $0x189] sm:$0xff] %vm263_vm1, %v371_v53  ;;  %v468_v47 = vmul.f32 %v3066_v55, %v2404_v15  ;;  %v568_v28 = vmul.f32 %v1129_v14, %v2407_v16  ;;  %v898_v7 = vadd.f32 %v866_v2, %v798_v26  ;;  %v1231_v36 = vld [vmem:[#allocation2 + $0x16a] sm:$0xff] }
  0x9f   : > { %v1198_v58 = vadd.f32 %v1166_v49, %v1098_v44  ;;  %v1067_v57 = vmul.f32 %v2431_v34, %v1031_v61  ;;  %v668_v27 = vmul.f32 %v1229_v60, %v2410_v17  ;;  %v1167_v22 = vmul.f32 %v2456_v3, %v1131_v18  ;;  %v1032_v46 = vld [vmem:[#allocation2 + $0x170] sm:$0xff] }
  0xa0   : > { %v1360_v9 = vld [vmem:[#allocation3 + $0xb8] sm:$0xff]  ;;  %v799_v0 = vadd.f32 %v767_v45, %v699_v5  ;;  %v768_v37 = vmul.f32 %v1031_v61, %v2417_v29  ;;  %v868_v63 = vmul.f32 %v1131_v18, %v2420_v30  ;;  %v998_v14 = vadd.f32 %v966_v10, %v898_v7  ;;  %v1132_v13 = vld [vmem:[#allocation2 + $0x171] sm:$0xff] }
  0xa1   : > { %2123 = vmatmul.mubr.msk.f32.gmra.mrb[6].mxu1 %vm263_vm1, %v1360_v9  ;;  %v1298_v55 = vadd.f32 %v1266_v24, %v1198_v58  ;;  %v1267_v38 = vmul.f32 %v3032_v35, %v1231_v36  ;;  %v600_v32 = vadd.f32 %v568_v28, %v468_v47  ;;  %v1068_v60 = vmul.f32 %v2431_v34, %v1032_v46 }
  0xa2   : > { %v899_v25 = vadd.f32 %v867_v48, %v799_v0  ;;  %v469_v21 = vmul.f32 %v3080_v23, %v2404_v15  ;;  %v569_v41 = vmul.f32 %v3082_v1, %v2407_v16  ;;  %v1099_v49 = vadd.f32 %v1067_v57, %v998_v14  ;;  %v1232_v23 = vld [vmem:[#allocation2 + $0x172] sm:$0xff] }
  0xa3   : > { %1330 = vst.msk [vmem:[#allocation3 + $0xc8] sm:$0xff] %vm263_vm1, %v1298_v55  ;;  %v1168_v20 = vmul.f32 %v2456_v3, %v1132_v13  ;;  %v700_v39 = vadd.f32 %v668_v27, %v600_v32  ;;  %v669_v12 = vmul.f32 %v1230_v6, %v2410_v17  ;;  %v968_v40 = vmul.f32 %v1231_v36, %v2423_v31 }
  0xa4   : > { %v999_v43 = vadd.f32 %v967_v51, %v899_v25  ;;  %v601_v11 = vadd.f32 %v569_v41, %v469_v21  ;;  %v769_v52 = vmul.f32 %v1032_v46, %v2417_v29  ;;  %v1199_v54 = vadd.f32 %v1167_v22, %v1099_v49  ;;  %v1033_v6 = vld [vmem:[#allocation2 + $0x180] sm:$0xff] }
  0xa5   : > { %v1361_v50 = vld [vmem:[#allocation3 + $0xc0] sm:$0xff]  ;;  %v800_v24 = vadd.f32 %v768_v37, %v700_v39  ;;  %v470_v1 = vmul.f32 %v1031_v61, %v2404_v15  ;;  %v570_v59 = vmul.f32 %v1131_v18, %v2407_v16  ;;  %v1268_v62 = vmul.f32 %v3032_v35, %v1232_v23  ;;  %v1133_v19 = vld [vmem:[#allocation2 + $0x181] sm:$0xff] }
  0xa6   : > { %2125 = vmatprep.mubr.msk.f32.mxu1 %vm263_vm1, %v1361_v50  ;;  %v1100_v33 = vadd.f32 %v1068_v60, %v999_v43  ;;  %v701_v42 = vadd.f32 %v669_v12, %v601_v11  ;;  %v869_v2 = vmul.f32 %v1132_v13, %v2420_v30  ;;  %v1299_v45 = vadd.f32 %v1267_v38, %v1199_v54  ;;  %v1034_v61 = vld [vmem:[#allocation2 + $0x188] sm:$0xff]  ;;  %v1036_v54 = vld [vmem:[#allocation2 + $0x1a0] sm:$0xff] }
  0xa7   : > { %v900_v4 = vadd.f32 %v868_v63, %v800_v24  ;;  %v1069_v56 = vmul.f32 %v2431_v34, %v1033_v6  ;;  %v1169_v8 = vmul.f32 %v2456_v3, %v1133_v19  ;;  %v969_v26 = vmul.f32 %v1232_v23, %v2423_v31  ;;  %v1233_v58 = vld [vmem:[#allocation2 + $0x182] sm:$0xff]  ;;  %v1035_v63 = vld [vmem:[#allocation2 + $0x198] sm:$0xff]  ;;  %v1234_v32 = vld [vmem:[#allocation2 + $0x18a] sm:$0xff] }
  0xa8   : > { %v1200_v53 = vadd.f32 %v1168_v20, %v1100_v33  ;;  %v801_v44 = vadd.f32 %v769_v52, %v701_v42  ;;  %1331 = vst.msk [vmem:[#allocation3 + $0xd0] sm:$0xff] %vm263_vm1, %v1299_v45  ;;  %v602_v48 = vadd.f32 %v570_v59, %v470_v1  ;;  %v670_v5 = vmul.f32 %v1231_v36, %v2410_v17  ;;  %v1134_v9 = vld [vmem:[#allocation2 + $0x189] sm:$0xff]  ;;  %v1135_v20 = vld [vmem:[#allocation2 + $0x199] sm:$0xff] }
  0xa9   : > { %v1000_v10 = vadd.f32 %v968_v40, %v900_v4  ;;  %v770_v51 = vmul.f32 %v1033_v6, %v2417_v29  ;;  %v1070_v57 = vmul.f32 %v2431_v34, %v1034_v61  ;;  %v1269_v27 = vmul.f32 %v3032_v35, %v1233_v58 }
  0xaa   : > { %v1362_v47 = vld [vmem:[#allocation3 + $0xc8] sm:$0xff]  ;;  %v1300_v28 = vadd.f32 %v1268_v62, %v1200_v53  ;;  %v901_v7 = vadd.f32 %v869_v2, %v801_v44  ;;  %v702_v22 = vadd.f32 %v670_v5, %v602_v48  ;;  %v870_v0 = vmul.f32 %v1133_v19, %v2420_v30  ;;  %v1136_v62 = vld [vmem:[#allocation2 + $0x1a1] sm:$0xff] }
  0xab   : > { %2126 = vmatmul.mubr.msk.f32.gmra.mrb[8].mxu1 %vm263_vm1, %v1362_v47  ;;  %v1101_v18 = vadd.f32 %v1069_v56, %v1000_v10  ;;  %v1170_v37 = vmul.f32 %v2456_v3, %v1134_v9  ;;  %v471_v55 = vmul.f32 %v1032_v46, %v2404_v15  ;;  %v571_v14 = vmul.f32 %v1132_v13, %v2407_v16  ;;  %v1235_v13 = vld [vmem:[#allocation2 + $0x19a] sm:$0xff]  ;;  %v1236_v2 = vld [vmem:[#allocation2 + $0x1a2] sm:$0xff] }
  0xac   : > { %1332 = vst.msk [vmem:[#allocation3 + $0xd8] sm:$0xff] %vm263_vm1, %v1300_v28  ;;  %v1001_v36 = vadd.f32 %v969_v26, %v901_v7  ;;  %v802_v25 = vadd.f32 %v770_v51, %v702_v22  ;;  %v970_v60 = vmul.f32 %v1233_v58, %v2423_v31  ;;  %v671_v21 = vmul.f32 %v1232_v23, %v2410_v17 }
  0xad   : > { %v1201_v38 = vadd.f32 %v1169_v8, %v1101_v18  ;;  %v1270_v49 = vmul.f32 %v3032_v35, %v1234_v32  ;;  %v603_v39 = vadd.f32 %v571_v14, %v471_v55  ;;  %v771_v12 = vmul.f32 %v1034_v61, %v2417_v29 }
  0xae   : > { %v1102_v41 = vadd.f32 %v1070_v57, %v1001_v36  ;;  %v902_v40 = vadd.f32 %v870_v0, %v802_v25  ;;  %v1071_v15 = vmul.f32 %v2431_v34, %v1035_v63  ;;  %v871_v52 = vmul.f32 %v1134_v9, %v2420_v30 }
  0xaf   : > { %v1301_v43 = vadd.f32 %v1269_v27, %v1201_v38  ;;  %v1363_v46 = vld [vmem:[#allocation3 + $0xd0] sm:$0xff]  ;;  %v703_v11 = vadd.f32 %v671_v21, %v603_v39  ;;  %v1171_v50 = vmul.f32 %v2456_v3, %v1135_v20  ;;  %v971_v24 = vmul.f32 %v1234_v32, %v2423_v31 }
  0xb0   : > { %v1202_v16 = vadd.f32 %v1170_v37, %v1102_v41  ;;  %2128 = vmatprep.mubr.msk.f32.mxu1 %vm263_vm1, %v1363_v46  ;;  %v1002_v17 = vadd.f32 %v970_v60, %v902_v40  ;;  %v1271_v33 = vmul.f32 %v3032_v35, %v1235_v13  ;;  %v1072_v6 = vmul.f32 %v2431_v34, %v1036_v54 }
  0xb1   : > { %1333 = vst.msk [vmem:[#allocation3 + $0xe0] sm:$0xff] %vm263_vm1, %v1301_v43  ;;  %v803_v29 = vadd.f32 %v771_v12, %v703_v11  ;;  %v1172_v4 = vmul.f32 %v2456_v3, %v1136_v62  ;;  %v1272_v53 = vmul.f32 %v3032_v35, %v1236_v2 }
  0xb2   : > { %v1302_v23 = vadd.f32 %v1270_v49, %v1202_v16  ;;  %v1103_v59 = vadd.f32 %v1071_v15, %v1002_v17 }
  0xb3   : > { %v1364_v1 = vld [vmem:[#allocation3 + $0xd8] sm:$0xff]  ;;  %v903_v30 = vadd.f32 %v871_v52, %v803_v29 }
  0xb4   : > { %2129 = vmatmul.mubr.msk.f32.gmra.mrb[10].mxu1 %vm263_vm1, %v1364_v1  ;;  %1334 = vst.msk [vmem:[#allocation3 + $0xe8] sm:$0xff] %vm263_vm1, %v1302_v23  ;;  %v1203_v42 = vadd.f32 %v1171_v50, %v1103_v59 }
  0xb5   : > { %v1003_v45 = vadd.f32 %v971_v24, %v903_v30 }
  0xb6   : > { %v1303_v56 = vadd.f32 %v1271_v33, %v1203_v42 }
  0xb7   : > { %v1104_v19 = vadd.f32 %v1072_v6, %v1003_v45 }
  0xb8   : > { %v1365_v31 = vld [vmem:[#allocation3 + $0xe0] sm:$0xff]  ;;  %1335 = vst.msk [vmem:[#allocation3 + $0xf0] sm:$0xff] %vm263_vm1, %v1303_v56 }
  0xb9   : > { %2131 = vmatprep.mubr.msk.f32.mxu1 %vm263_vm1, %v1365_v31  ;;  %v1204_v8 = vadd.f32 %v1172_v4, %v1104_v19 }
  0xbb   : > { %v1366_v44 = vld [vmem:[#allocation3 + $0xe8] sm:$0xff]  ;;  %v1304_v34 = vadd.f32 %v1272_v53, %v1204_v8 }
  0xbc   : > { %2132 = vmatmul.mubr.msk.f32.gmra.mrb[12].mxu1 %vm263_vm1, %v1366_v44 }
  0xbd   : > { %1336 = vst.msk [vmem:[#allocation3 + $0xf8] sm:$0xff] %vm263_vm1, %v1304_v34 }
  0xbf   : > { %v1367_v26 = vld [vmem:[#allocation3 + $0xf0] sm:$0xff] }
  0xc0   : > { %2134 = vmatprep.mubr.msk.f32.mxu1 %vm263_vm1, %v1367_v26 }
  0xc4   : > { %v1368_v3 = vld [vmem:[#allocation3 + $0xf8] sm:$0xff] }
  0xc5   : > { %2135 = vmatmul.mubr.msk.f32.gmra.mrb[14].mxu1 %vm263_vm1, %v1368_v3 }
 0x116   : > { %v2091_v35 = vpop.f32.mrb[0].mxu0 }
 0x117   : > { %1696 = vst.msk [vmem:[%s3181_s26 + $0x8] sm:$0xff] %vm263_vm1, %v2091_v35  ;;  %v1728_v10 = vsel %vm263_vm1, %v2091_v35, 0.0  ;;  %v1798_v61 = vmul.f32 %v2091_v35, %v2091_v35  ;;  %v1536_v48 = vpop.f32.mrb[1].mxu0 }
 0x118   : > { %1695 = vst.msk [vmem:[%s3181_s26] sm:$0xff] %vm263_vm1, %v1536_v48  ;;  %v1727_v5 = vsel %vm263_vm1, %v1536_v48, 0.0  ;;  %v1797_v51 = vmul.f32 %v1536_v48, %v1536_v48 }
 0x119   : > { %v1830_v47 = vsel %vm263_vm1, %v1798_v61, 0.0  ;;  %v1729_v28 = vadd.f32 %v1728_v10, %v1727_v5 }
 0x11a   : > { %v1829_v58 = vsel %vm263_vm1, %v1797_v51, 0.0 }
 0x11b   : > { %v1831_v7 = vadd.f32 %v1830_v47, %v1829_v58 }
 0x11f   : > { %v2094_v57 = vpop.f32.mrb[2].mxu0 }
 0x120   : > { %1698 = vst.msk [vmem:[%s3181_s26 + $0x18] sm:$0xff] %vm263_vm1, %v2094_v57  ;;  %v1546_v18 = vpop.f32.mrb[3].mxu0  ;;  %v1800_v27 = vmul.f32 %v2094_v57, %v2094_v57  ;;  %v1732_v36 = vsel %vm263_vm1, %v2094_v57, 0.0 }
 0x121   : > { %1697 = vst.msk [vmem:[%s3181_s26 + $0x10] sm:$0xff] %vm263_vm1, %v1546_v18  ;;  %v1730_v9 = vsel %vm263_vm1, %v1546_v18, 0.0  ;;  %v1799_v22 = vmul.f32 %v1546_v18, %v1546_v18 }
 0x122   : > { %v1731_v0 = vadd.f32 %v1730_v9, %v1729_v28  ;;  %v1834_v14 = vsel %vm263_vm1, %v1800_v27, 0.0 }
 0x123   : > { %v1832_v37 = vsel %vm263_vm1, %v1799_v22, 0.0 }
 0x124   : > { %v1833_v63 = vadd.f32 %v1832_v37, %v1831_v7  ;;  %v1733_v55 = vadd.f32 %v1732_v36, %v1731_v0 }
 0x126   : > { %v1835_v38 = vadd.f32 %v1834_v14, %v1833_v63 }
 0x128   : > { %v2097_v32 = vpop.f32.mrb[4].mxu0 }
 0x129   : > { %1700 = vst.msk [vmem:[%s3181_s26 + $0x28] sm:$0xff] %vm263_vm1, %v2097_v32  ;;  %v1556_v25 = vpop.f32.mrb[5].mxu0  ;;  %v1802_v60 = vmul.f32 %v2097_v32, %v2097_v32  ;;  %v1736_v20 = vsel %vm263_vm1, %v2097_v32, 0.0 }
 0x12a   : > { %1699 = vst.msk [vmem:[%s3181_s26 + $0x20] sm:$0xff] %vm263_vm1, %v1556_v25  ;;  %v1734_v21 = vsel %vm263_vm1, %v1556_v25, 0.0  ;;  %v1801_v41 = vmul.f32 %v1556_v25, %v1556_v25 }
 0x12b   : > { %v1735_v49 = vadd.f32 %v1734_v21, %v1733_v55  ;;  %v1838_v40 = vsel %vm263_vm1, %v1802_v60, 0.0 }
 0x12c   : > { %v1836_v39 = vsel %vm263_vm1, %v1801_v41, 0.0 }
 0x12d   : > { %v1837_v12 = vadd.f32 %v1836_v39, %v1835_v38  ;;  %v1737_v43 = vadd.f32 %v1736_v20, %v1735_v49 }
 0x12f   : > { %v1839_v15 = vadd.f32 %v1838_v40, %v1837_v12  ;;  %v2100_v46 = vpop.f32.mrb[6].mxu0 }
 0x130   : > { %1702 = vst.msk [vmem:[%s3181_s26 + $0x38] sm:$0xff] %vm263_vm1, %v2100_v46  ;;  %v1566_v16 = vpop.f32.mrb[7].mxu0  ;;  %v1804_v13 = vmul.f32 %v2100_v46, %v2100_v46  ;;  %v1740_v50 = vsel %vm263_vm1, %v2100_v46, 0.0 }
 0x131   : > { %1701 = vst.msk [vmem:[%s3181_s26 + $0x30] sm:$0xff] %vm263_vm1, %v1566_v16  ;;  %v1738_v11 = vsel %vm263_vm1, %v1566_v16, 0.0  ;;  %v1803_v52 = vmul.f32 %v1566_v16, %v1566_v16 }
 0x132   : > { %v1739_v17 = vadd.f32 %v1738_v11, %v1737_v43  ;;  %v1842_v24 = vsel %vm263_vm1, %v1804_v13, 0.0 }
 0x133   : > { %v1840_v54 = vsel %vm263_vm1, %v1803_v52, 0.0 }
 0x134   : > { %v1841_v23 = vadd.f32 %v1840_v54, %v1839_v15  ;;  %v1741_v29 = vadd.f32 %v1740_v50, %v1739_v17 }
 0x136   : > { %v1843_v1 = vadd.f32 %v1842_v24, %v1841_v23 }
 0x139   : > { %v2103_v59 = vpop.f32.mrb[8].mxu0 }
 0x13a   : > { %1704 = vst.msk [vmem:[%s3181_s26 + $0x48] sm:$0xff] %vm263_vm1, %v2103_v59  ;;  %v1576_v33 = vpop.f32.mrb[9].mxu0  ;;  %v1806_v62 = vmul.f32 %v2103_v59, %v2103_v59  ;;  %v1744_v2 = vsel %vm263_vm1, %v2103_v59, 0.0 }
 0x13b   : > { %1703 = vst.msk [vmem:[%s3181_s26 + $0x40] sm:$0xff] %vm263_vm1, %v1576_v33  ;;  %v1742_v30 = vsel %vm263_vm1, %v1576_v33, 0.0  ;;  %v1805_v6 = vmul.f32 %v1576_v33, %v1576_v33 }
 0x13c   : > { %v1743_v42 = vadd.f32 %v1742_v30, %v1741_v29  ;;  %v1846_v31 = vsel %vm263_vm1, %v1806_v62, 0.0 }
 0x13d   : > { %v1844_v45 = vsel %vm263_vm1, %v1805_v6, 0.0 }
 0x13e   : > { %v1845_v4 = vadd.f32 %v1844_v45, %v1843_v1  ;;  %v1745_v56 = vadd.f32 %v1744_v2, %v1743_v42 }
 0x140   : > { %v1847_v19 = vadd.f32 %v1846_v31, %v1845_v4 }
 0x141   : > { %v2106_v53 = vpop.f32.mrb[10].mxu0 }
 0x142   : > { %1706 = vst.msk [vmem:[%s3181_s26 + $0x58] sm:$0xff] %vm263_vm1, %v2106_v53  ;;  %v1586_v8 = vpop.f32.mrb[11].mxu0  ;;  %v1808_v44 = vmul.f32 %v2106_v53, %v2106_v53  ;;  %v1748_v35 = vsel %vm263_vm1, %v2106_v53, 0.0 }
 0x143   : > { %1705 = vst.msk [vmem:[%s3181_s26 + $0x50] sm:$0xff] %vm263_vm1, %v1586_v8  ;;  %v1746_v34 = vsel %vm263_vm1, %v1586_v8, 0.0  ;;  %v1807_v26 = vmul.f32 %v1586_v8, %v1586_v8 }
 0x144   : > { %v1747_v3 = vadd.f32 %v1746_v34, %v1745_v56  ;;  %v1850_v5 = vsel %vm263_vm1, %v1808_v44, 0.0 }
 0x145   : > { %v1848_v10 = vsel %vm263_vm1, %v1807_v26, 0.0 }
 0x146   : > { %v1849_v61 = vadd.f32 %v1848_v10, %v1847_v19  ;;  %v1749_v48 = vadd.f32 %v1748_v35, %v1747_v3 }
 0x148   : > { %v1851_v51 = vadd.f32 %v1850_v5, %v1849_v61 }
 0x14a   : > { %v2109_v47 = vpop.f32.mrb[12].mxu0 }
 0x14b   : > { %1708 = vst.msk [vmem:[%s3181_s26 + $0x68] sm:$0xff] %vm263_vm1, %v2109_v47  ;;  %v1596_v28 = vpop.f32.mrb[13].mxu0  ;;  %v1810_v58 = vmul.f32 %v2109_v47, %v2109_v47  ;;  %v1752_v27 = vsel %vm263_vm1, %v2109_v47, 0.0 }
 0x14c   : > { %1707 = vst.msk [vmem:[%s3181_s26 + $0x60] sm:$0xff] %vm263_vm1, %v1596_v28  ;;  %v1750_v7 = vsel %vm263_vm1, %v1596_v28, 0.0  ;;  %v1809_v57 = vmul.f32 %v1596_v28, %v1596_v28 }
 0x14d   : > { %v1751_v18 = vadd.f32 %v1750_v7, %v1749_v48  ;;  %v1854_v36 = vsel %vm263_vm1, %v1810_v58, 0.0 }
 0x14e   : > { %v1852_v9 = vsel %vm263_vm1, %v1809_v57, 0.0 }
 0x14f   : > { %v1853_v22 = vadd.f32 %v1852_v9, %v1851_v51  ;;  %v1753_v0 = vadd.f32 %v1752_v27, %v1751_v18 }
 0x151   : > { %v1855_v37 = vadd.f32 %v1854_v36, %v1853_v22 }
 0x153   : > { %v2112_v63 = vpop.f32.mrb[14].mxu0 }
 0x154   : > { %1710 = vst.msk [vmem:[%s3181_s26 + $0x78] sm:$0xff] %vm263_vm1, %v2112_v63  ;;  %v1606_v55 = vpop.f32.mrb[15].mxu0  ;;  %v1812_v14 = vmul.f32 %v2112_v63, %v2112_v63  ;;  %v1756_v60 = vsel %vm263_vm1, %v2112_v63, 0.0 }
 0x155   : > { %1709 = vst.msk [vmem:[%s3181_s26 + $0x70] sm:$0xff] %vm263_vm1, %v1606_v55  ;;  %v1754_v38 = vsel %vm263_vm1, %v1606_v55, 0.0  ;;  %v1811_v32 = vmul.f32 %v1606_v55, %v1606_v55 }
 0x156   : > { %v1755_v25 = vadd.f32 %v1754_v38, %v1753_v0  ;;  %v1858_v20 = vsel %vm263_vm1, %v1812_v14, 0.0 }
 0x157   : > { %v1856_v21 = vsel %vm263_vm1, %v1811_v32, 0.0 }
 0x158   : > { %v1757_v41 = vadd.f32 %v1756_v60, %v1755_v25  ;;  %v1857_v49 = vadd.f32 %v1856_v21, %v1855_v37 }
 0x15a   : > { %v1859_v39 = vadd.f32 %v1858_v20, %v1857_v49 }
 0x15c   : > { %v2115_v12 = vpop.f32.mrb[0].mxu1 }
 0x15d   : > { %1712 = vst.msk [vmem:[%s3181_s26 + $0x88] sm:$0xff] %vm263_vm1, %v2115_v12  ;;  %v1616_v43 = vpop.f32.mrb[1].mxu1  ;;  %v1814_v40 = vmul.f32 %v2115_v12, %v2115_v12  ;;  %v1760_v13 = vsel %vm263_vm1, %v2115_v12, 0.0 }
 0x15e   : > { %1711 = vst.msk [vmem:[%s3181_s26 + $0x80] sm:$0xff] %vm263_vm1, %v1616_v43  ;;  %v1758_v15 = vsel %vm263_vm1, %v1616_v43, 0.0  ;;  %v1813_v46 = vmul.f32 %v1616_v43, %v1616_v43 }
 0x15f   : > { %v1759_v16 = vadd.f32 %v1758_v15, %v1757_v41  ;;  %v1862_v50 = vsel %vm263_vm1, %v1814_v40, 0.0 }
 0x160   : > { %v1860_v11 = vsel %vm263_vm1, %v1813_v46, 0.0 }
 0x161   : > { %v1861_v52 = vadd.f32 %v1860_v11, %v1859_v39  ;;  %v1761_v17 = vadd.f32 %v1760_v13, %v1759_v16 }
 0x163   : > { %v1863_v54 = vadd.f32 %v1862_v50, %v1861_v52 }
 0x164   : > { %v2118_v23 = vpop.f32.mrb[2].mxu1 }
 0x165   : > { %1714 = vst.msk [vmem:[%s3181_s26 + $0x98] sm:$0xff] %vm263_vm1, %v2118_v23  ;;  %v1626_v29 = vpop.f32.mrb[3].mxu1  ;;  %v1816_v24 = vmul.f32 %v2118_v23, %v2118_v23  ;;  %v1764_v62 = vsel %vm263_vm1, %v2118_v23, 0.0 }
 0x166   : > { %1713 = vst.msk [vmem:[%s3181_s26 + $0x90] sm:$0xff] %vm263_vm1, %v1626_v29  ;;  %v1762_v1 = vsel %vm263_vm1, %v1626_v29, 0.0  ;;  %v1815_v59 = vmul.f32 %v1626_v29, %v1626_v29 }
 0x167   : > { %v1763_v33 = vadd.f32 %v1762_v1, %v1761_v17  ;;  %v1866_v2 = vsel %vm263_vm1, %v1816_v24, 0.0 }
 0x168   : > { %v1864_v30 = vsel %vm263_vm1, %v1815_v59, 0.0 }
 0x169   : > { %v1865_v6 = vadd.f32 %v1864_v30, %v1863_v54  ;;  %v1765_v42 = vadd.f32 %v1764_v62, %v1763_v33 }
 0x16b   : > { %v1867_v45 = vadd.f32 %v1866_v2, %v1865_v6 }
 0x16d   : > { %v2121_v4 = vpop.f32.mrb[4].mxu1 }
 0x16e   : > { %1716 = vst.msk [vmem:[%s3181_s26 + $0xa8] sm:$0xff] %vm263_vm1, %v2121_v4  ;;  %v1636_v56 = vpop.f32.mrb[5].mxu1  ;;  %v1818_v31 = vmul.f32 %v2121_v4, %v2121_v4  ;;  %v1768_v44 = vsel %vm263_vm1, %v2121_v4, 0.0 }
 0x16f   : > { %1715 = vst.msk [vmem:[%s3181_s26 + $0xa0] sm:$0xff] %vm263_vm1, %v1636_v56  ;;  %v1766_v19 = vsel %vm263_vm1, %v1636_v56, 0.0  ;;  %v1817_v53 = vmul.f32 %v1636_v56, %v1636_v56 }
 0x170   : > { %v1767_v8 = vadd.f32 %v1766_v19, %v1765_v42  ;;  %v1870_v35 = vsel %vm263_vm1, %v1818_v31, 0.0 }
 0x171   : > { %v1868_v34 = vsel %vm263_vm1, %v1817_v53, 0.0 }
 0x172   : > { %v1869_v26 = vadd.f32 %v1868_v34, %v1867_v45  ;;  %v1769_v3 = vadd.f32 %v1768_v44, %v1767_v8 }
 0x174   : > { %v2124_v10 = vpop.f32.mrb[6].mxu1  ;;  %v1871_v61 = vadd.f32 %v1870_v35, %v1869_v26 }
 0x175   : > { %1718 = vst.msk [vmem:[%s3181_s26 + $0xb8] sm:$0xff] %vm263_vm1, %v2124_v10  ;;  %v1646_v48 = vpop.f32.mrb[7].mxu1  ;;  %v1820_v5 = vmul.f32 %v2124_v10, %v2124_v10  ;;  %v1772_v58 = vsel %vm263_vm1, %v2124_v10, 0.0 }
 0x176   : > { %1717 = vst.msk [vmem:[%s3181_s26 + $0xb0] sm:$0xff] %vm263_vm1, %v1646_v48  ;;  %v1770_v51 = vsel %vm263_vm1, %v1646_v48, 0.0  ;;  %v1819_v47 = vmul.f32 %v1646_v48, %v1646_v48 }
 0x177   : > { %v1771_v28 = vadd.f32 %v1770_v51, %v1769_v3  ;;  %v1874_v27 = vsel %vm263_vm1, %v1820_v5, 0.0 }
 0x178   : > { %v1872_v7 = vsel %vm263_vm1, %v1819_v47, 0.0 }
 0x179   : > { %v1873_v57 = vadd.f32 %v1872_v7, %v1871_v61  ;;  %v1773_v18 = vadd.f32 %v1772_v58, %v1771_v28 }
 0x17b   : > { %v1875_v9 = vadd.f32 %v1874_v27, %v1873_v57 }
 0x17e   : > { %v2127_v22 = vpop.f32.mrb[8].mxu1 }
 0x17f   : > { %1720 = vst.msk [vmem:[%s3181_s26 + $0xc8] sm:$0xff] %vm263_vm1, %v2127_v22  ;;  %v1656_v0 = vpop.f32.mrb[9].mxu1  ;;  %v1822_v36 = vmul.f32 %v2127_v22, %v2127_v22  ;;  %v1776_v14 = vsel %vm263_vm1, %v2127_v22, 0.0 }
 0x180   : > { %1719 = vst.msk [vmem:[%s3181_s26 + $0xc0] sm:$0xff] %vm263_vm1, %v1656_v0  ;;  %v1774_v37 = vsel %vm263_vm1, %v1656_v0, 0.0  ;;  %v1821_v63 = vmul.f32 %v1656_v0, %v1656_v0 }
 0x181   : > { %v1775_v55 = vadd.f32 %v1774_v37, %v1773_v18  ;;  %v1878_v60 = vsel %vm263_vm1, %v1822_v36, 0.0 }
 0x182   : > { %v1876_v38 = vsel %vm263_vm1, %v1821_v63, 0.0 }
 0x183   : > { %v1877_v32 = vadd.f32 %v1876_v38, %v1875_v9  ;;  %v1777_v25 = vadd.f32 %v1776_v14, %v1775_v55 }
 0x185   : > { %v1879_v21 = vadd.f32 %v1878_v60, %v1877_v32 }
 0x187   : > { %v2130_v41 = vpop.f32.mrb[10].mxu1 }
 0x188   : > { %1722 = vst.msk [vmem:[%s3181_s26 + $0xd8] sm:$0xff] %vm263_vm1, %v2130_v41  ;;  %v1666_v49 = vpop.f32.mrb[11].mxu1  ;;  %v1824_v20 = vmul.f32 %v2130_v41, %v2130_v41  ;;  %v1780_v40 = vsel %vm263_vm1, %v2130_v41, 0.0 }
 0x189   : > { %1721 = vst.msk [vmem:[%s3181_s26 + $0xd0] sm:$0xff] %vm263_vm1, %v1666_v49  ;;  %v1778_v39 = vsel %vm263_vm1, %v1666_v49, 0.0  ;;  %v1823_v12 = vmul.f32 %v1666_v49, %v1666_v49 }
 0x18a   : > { %v1779_v43 = vadd.f32 %v1778_v39, %v1777_v25  ;;  %v1882_v13 = vsel %vm263_vm1, %v1824_v20, 0.0 }
 0x18b   : > { %v1880_v15 = vsel %vm263_vm1, %v1823_v12, 0.0 }
 0x18c   : > { %v1881_v46 = vadd.f32 %v1880_v15, %v1879_v21  ;;  %v1781_v16 = vadd.f32 %v1780_v40, %v1779_v43 }
 0x18e   : > { %v1883_v11 = vadd.f32 %v1882_v13, %v1881_v46 }
 0x18f   : > { %v2133_v52 = vpop.f32.mrb[12].mxu1 }
 0x190   : > { %1724 = vst.msk [vmem:[%s3181_s26 + $0xe8] sm:$0xff] %vm263_vm1, %v2133_v52  ;;  %v1676_v17 = vpop.f32.mrb[13].mxu1  ;;  %v1826_v50 = vmul.f32 %v2133_v52, %v2133_v52  ;;  %v1784_v24 = vsel %vm263_vm1, %v2133_v52, 0.0 }
 0x191   : > { %1723 = vst.msk [vmem:[%s3181_s26 + $0xe0] sm:$0xff] %vm263_vm1, %v1676_v17  ;;  %v1782_v54 = vsel %vm263_vm1, %v1676_v17, 0.0  ;;  %v1825_v23 = vmul.f32 %v1676_v17, %v1676_v17 }
 0x192   : > { %v1783_v29 = vadd.f32 %v1782_v54, %v1781_v16  ;;  %v1886_v62 = vsel %vm263_vm1, %v1826_v50, 0.0 }
 0x193   : > { %v1884_v1 = vsel %vm263_vm1, %v1825_v23, 0.0 }
 0x194   : > { %v1885_v59 = vadd.f32 %v1884_v1, %v1883_v11  ;;  %v1785_v33 = vadd.f32 %v1784_v24, %v1783_v29 }
 0x196   : > { %v1887_v30 = vadd.f32 %v1886_v62, %v1885_v59 }
 0x198   : > { %v2136_v6 = vpop.f32.mrb[14].mxu1 }
 0x199   : > { %1726 = vst.msk [vmem:[%s3181_s26 + $0xf8] sm:$0xff] %vm263_vm1, %v2136_v6  ;;  %v1686_v42 = vpop.f32.mrb[15].mxu1  ;;  %v1828_v2 = vmul.f32 %v2136_v6, %v2136_v6  ;;  %v1788_v31 = vsel %vm263_vm1, %v2136_v6, 0.0 }
 0x19a   : > { %1725 = vst.msk [vmem:[%s3181_s26 + $0xf0] sm:$0xff] %vm263_vm1, %v1686_v42  ;;  %v1786_v45 = vsel %vm263_vm1, %v1686_v42, 0.0  ;;  %v1827_v4 = vmul.f32 %v1686_v42, %v1686_v42 }
 0x19b   : > { %v1787_v56 = vadd.f32 %v1786_v45, %v1785_v33  ;;  %v1890_v44 = vsel %vm263_vm1, %v1828_v2, 0.0 }
 0x19c   : > { %v1888_v19 = vsel %vm263_vm1, %v1827_v4, 0.0 }
 0x19d   : > { %v1789_v53 = vadd.f32 %v1788_v31, %v1787_v56  ;;  %v1889_v8 = vadd.f32 %v1888_v19, %v1887_v30 }
 0x19f   : > { %v1790_v34 = vrot.slane %v1789_v53, 4  ;;  %v1891_v26 = vadd.f32 %v1890_v44, %v1889_v8 }
 0x1a1   : > { %v1791_v3 = vadd.f32 %v1790_v34, %v1789_v53  ;;  %v1892_v35 = vrot.slane %v1891_v26, 4 }
 0x1a3   : > { %v1792_v10 = vrot.slane %v1791_v3, 2  ;;  %v1893_v61 = vadd.f32 %v1892_v35, %v1891_v26 }
 0x1a5   : > { %v1793_v48 = vadd.f32 %v1792_v10, %v1791_v3  ;;  %v1894_v5 = vrot.slane %v1893_v61, 2 }
 0x1a7   : > { %v1794_v51 = vrot.slane %v1793_v48, 1  ;;  %v1895_v47 = vadd.f32 %v1894_v5, %v1893_v61 }
 0x1a9   : > { %v1795_v28 = vadd.f32 %v1794_v51, %v1793_v48  ;;  %v1896_v58 = vrot.slane %v1895_v47, 1 }
 0x1ab   : > { %1796 = vst.msk [vmem:[%s252_s9] sm:$0x1] %vm273_vm2, %v1795_v28  ;;  %v1897_v7 = vadd.f32 %v1896_v58, %v1895_v47 }
 0x1ad   : > { %1898 = vst.msk [vmem:[%s252_s9 + $0x1] sm:$0x1] %vm273_vm2, %v1897_v7 }
 0x1ae   : > { %2193 = shalt.err (!%p2190_p3)
}
 0x1af   : > { %s2194_s18 = scalar_lea.hbm %s3317_s13, 32  ;;  %s2198_s24 = scalar_lea.hbm %s3366_s6, 64 }
 0x1b0   : > { %p2195_p4 = scmp.ne.s32.totalorder %s3317_s13, %s2194_s18  ;;  %p2199_p9 = scmp.lt.u32.totalorder %s3317_s13, %s3366_s6 }
 0x1b1   : > { %p2200_p10 = scmp.lt.u32.totalorder %s2198_s24, %s2194_s18  ;;  %p2202_p12 = scmp.lt.u32.totalorder %s2194_s18, %s3317_s13 }
 0x1b2   : > { %p2196_p7 = pnand %p2195_p4, %p2319_p5 }
 0x1b3   : > { %p2201_p11 = por %p2200_p10, %p2199_p9 }
 0x1b4   : > { %p2197_p8 = pneg %p2196_p7 }
 0x1b5   : > { %p2203_p13 = por %p2202_p12, %p2201_p11 }
 0x1b7   : > { %p2204_p0 = pnand %p2203_p13, %p2197_p8 }
 0x1b9   : > { %2207 = shalt.err (!%p2204_p0)
}
 0x1ba   : > { %2139 = dma.vmem_to_hbm [thread:$0]  (%p2319_p5), %s3319_s10, 32, %s3317_s13, %s1905_s23  }
 0x1bb PF: > { %p2145_p1 = scmp.ge.s32.totalorder %s2242_s2, 2  ;;  %s1941_s7 = sand.u32 1, %s2230_s21  }
 0x1bc   : > { %s1942_s8 = scalar_lea.sflag [#allocation5], %s1941_s7 }
 0x1bd   : > { %p2142_p2 = pnand %p2145_p1, %p2323_p6 }
 0x1bf   : > { %2225 = dma.done.wait (!%p2142_p2), %s1942_s8, 32  }
 0x1c0   : > { %2227 = vsyncadd (!%p2142_p2), %s1942_s8, 4294967264  ;;  %p17_p3 = scmp.ge.s32.totalorder %s2306_s25, 4   ;;  %s3369_s21 = smov %s2234_s1 }
 0x1c1   : > { %s3370_s1 = smov %s2238_s22  ;;  %s3371_s22 = smov %s2317_s28 }
 0x1c2   : > { %s3372_s2 = smov %s2306_s25  ;;  %19 = sbr.rel (!%p17_p3) target bundleno = 3 (0x3), region = 90 }
 0x1c9   :  { %1947 = vsyncpa [#allocation5], 1 }
 0x1ca   :  { %1949 = vsyncpa [#allocation5 + $0x1], 1 }

</bundles_post_ra>
